<compile_context>
chip_gen: v5e
topology: v5e:2x2
jax: 0.10.0
libtpu: 0.0.40
codegen_flags: <defaults>
</compile_context>

<pallas_src>
import functools

import jax
import jax.numpy as jnp
from jax.experimental import pallas as pl
from jax.experimental.pallas import tpu as pltpu

_LANE = 128          # pad feature dims to multiples of the lane width
_TILE_ALIGN = 32     # batch-tile granularity (covers f32/bf16/int8 sublane packing)
_NEG_FILL = -1e30    # output-layer bias fill for padded softmax lanes (exp -> 0)


def _round_up(n: int, m: int) -> int:
    return ((n + m - 1) // m) * m


def _cdiv(a: int, b: int) -> int:
    return -(-a // b)


def _pick_batch_tile(batch: int, max_tile: int):
    """Largest aligned batch tile <= max_tile, with >=2 grid steps when possible."""
    rb = _round_up(batch, _TILE_ALIGN)
    min_tiles = 2 if rb >= 2 * _TILE_ALIGN else 1   # keep both v7x TCs busy
    n_tiles = max(min_tiles, _cdiv(rb, max_tile))
    tm = _round_up(_cdiv(rb, n_tiles), _TILE_ALIGN)
    padded_batch = _round_up(rb, tm)
    return tm, padded_batch


def _vmem_estimate(tm, in_pad, padded, mm_itemsize, hid_itemsize, emit_hidden, w_bytes):
    """Rough pipeline footprint: resident (single-buffered) weights + 2x tiles + temps."""
    x_tile = tm * in_pad * mm_itemsize
    out_tiles = tm * padded[-1] * 4
    if emit_hidden:
        out_tiles += sum(tm * p * hid_itemsize for p in padded[:-1])
    temporaries = 4 * tm * max([in_pad] + padded) * 4
    return w_bytes + 2 * (x_tile + out_tiles) + temporaries


def _resident_spec(shape):
    """Constant-index (grid-resident) BlockSpec, single-buffered when supported."""
    try:
        return pl.BlockSpec(shape, lambda i: (0, 0), pipeline_mode=pl.Buffered(1))
    except TypeError:  # older BlockSpec without pipeline_mode kwarg
        return pl.BlockSpec(shape, lambda i: (0, 0))


def _build_mlp_kernel(n_hidden: int, emit_hidden: bool, matmul_dtype):
    """Fused kernel: n_hidden (Linear -> *speed -> LeakyReLU) layers + softmax head."""
    n_layers = n_hidden + 1

    def kernel(scale_ref, x_ref, *refs):
        wb_refs = refs[:2 * n_layers]
        out_refs = refs[2 * n_layers:]

        # scale_ref[0] = sensor_sensitivity: intentionally unused — dead code in
        # the reference module (scaled x is never fed to the layers).
        processing_speed = scale_ref[1]

        a = x_ref[...]
        for i in range(n_hidden):
            w = wb_refs[2 * i][...]
            b = wb_refs[2 * i + 1][...]          # f32 bias, added to f32 accumulator
            z = jnp.dot(a, w, preferred_element_type=jnp.float32) + b
            z = z * processing_speed
            a_f32 = jnp.maximum(z, 0.01 * z)     # LeakyReLU(0.01), single VPU max
            if emit_hidden:
                out_refs[i][...] = a_f32.astype(out_refs[i].dtype)
            a = a_f32.astype(matmul_dtype)

        # Output layer: linear -> softmax(dim=-1). Padded columns carry a -1e30
        # bias (f32) and zero W columns, so exp(...) == 0 there — no mass leak.
        w = wb_refs[2 * n_hidden][...]
        b = wb_refs[2 * n_hidden + 1][...]
        z = jnp.dot(a, w, preferred_element_type=jnp.float32) + b
        m = jnp.max(z, axis=-1, keepdims=True)
        e = jnp.exp(z - m)
        denom = jnp.sum(e, axis=-1, keepdims=True)
        # Exact normalization (rows sum to 1 within f32 roundoff). The approx EUP
        # reciprocal previously violated the sum-to-1 property beyond 1e-3.
        out_refs[-1][...] = (e / denom).astype(out_refs[-1].dtype)

    return kernel


@functools.partial(
    jax.jit,
    static_argnames=("matmul_dtype", "hidden_out_dtype",
                     "return_hidden_activations", "max_batch_tile"))
def adaptive_nn_forward(x, params, sensor_sensitivity, processing_speed,
                        *, matmul_dtype=jnp.bfloat16,
                        hidden_out_dtype=jnp.bfloat16,
                        return_hidden_activations=True,
                        max_batch_tile=512):
    """Full forward pass in one batch-tiled pallas_call.

    Args:
      x: (batch, input_size) float32.
      params: list of (W, b) with W: (in, out) [transposed vs. torch], b: (out,).
      sensor_sensitivity, processing_speed: scalars (genetic modifiers).
      matmul_dtype: dtype fed to the MXU (bf16 on v6e/v7x; jnp.float32 for tight parity).
      hidden_out_dtype: HBM writeback dtype of hidden activations (bf16 halves traffic).
      return_hidden_activations: if False, skip HBM writeback of hidden layers.
      max_batch_tile: upper bound for the batch tile (sweepable).

    Returns:
      (output, activations) matching the PyTorch module:
        output: (batch, output_size) softmax probabilities
        activations: [x, a_1, ..., a_{n_hidden}, output]
        (when return_hidden_activations=False: [x, output])
    """
    n_layers = len(params)
    n_hidden = n_layers - 1
    batch, in_features = x.shape
    mm_dtype = jnp.dtype(matmul_dtype)
    hid_dtype = jnp.dtype(hidden_out_dtype)

    widths = [w.shape[1] for (w, _) in params]          # true layer output widths
    padded = [_round_up(w, _LANE) for w in widths]      # lane-dense widths
    in_pad = _round_up(in_features, _LANE)              # lane-dense x / aligned layer-0 K
    in_dims = [in_pad] + padded[:-1]                    # padded K dims per layer

    # Generation-aware VMEM budget: v7x has 64 MiB/TC vs 128 MiB on v5e/v6e.
    try:
        vmem_cap = int(getattr(pltpu.get_tpu_info(), "vmem_capacity_bytes", 64 << 20))
    except Exception:
        vmem_cap = 64 << 20
    budget = max(32 << 20, min(100 << 20, vmem_cap - (12 << 20)))   # leave headroom

    # Resident (single-buffered) weight/bias footprint.
    w_bytes = sum(in_dims[l] * padded[l] * mm_dtype.itemsize + padded[l] * 4
                  for l in range(n_layers))

    # Pick the largest batch tile that fits the per-generation budget.
    max_tile = max(_TILE_ALIGN, int(max_batch_tile))
    while True:
        tm, padded_batch = _pick_batch_tile(batch, max_tile)
        est = _vmem_estimate(tm, in_pad, padded, mm_dtype.itemsize, hid_dtype.itemsize,
                             return_hidden_activations, w_bytes)
        if 2 * est <= budget or max_tile <= 64:
            break
        max_tile //= 2
    num_tiles = padded_batch // tm
    vmem_limit = int(min(budget, max(32 << 20, 2 * est)))

    scale = jnp.asarray([sensor_sensitivity, processing_speed], jnp.float32)

    # Pad batch rows (zeros, sliced off) and x columns (zeros, matched by zero W rows).
    x_p = jnp.pad(x.astype(jnp.float32),
                  ((0, padded_batch - batch),
                   (0, in_pad - in_features))).astype(mm_dtype)

    flat_wb, wb_specs = [], []
    for l, (w, b) in enumerate(params):
        w = w.astype(jnp.float32)
        b = b.astype(jnp.float32).reshape(1, -1)
        pad_rows = in_dims[l] - w.shape[0]
        pad_cols = padded[l] - w.shape[1]
        w_p = jnp.pad(w, ((0, pad_rows), (0, pad_cols))).astype(mm_dtype)
        # Hidden layers: zero-pad bias (LeakyReLU(0)=0, next layer's padded W rows are
        # zero). Output layer: -1e30 so softmax mass in padded lanes is exactly zero.
        # Bias stays float32 on purpose (added to the f32 MXU accumulator).
        fill = 0.0 if l < n_hidden else _NEG_FILL
        b_p = jnp.pad(b, ((0, 0), (0, pad_cols)), constant_values=fill)
        flat_wb += [w_p, b_p]
        wb_specs += [_resident_spec(w_p.shape), _resident_spec(b_p.shape)]

    out_shapes, out_specs = [], []
    if return_hidden_activations:
        for l in range(n_hidden):
            out_shapes.append(
                jax.ShapeDtypeStruct((padded_batch, padded[l]), hid_dtype))
            out_specs.append(pl.BlockSpec((tm, padded[l]), lambda i: (i, 0)))
    out_shapes.append(
        jax.ShapeDtypeStruct((padded_batch, padded[-1]), jnp.float32))
    out_specs.append(pl.BlockSpec((tm, padded[-1]), lambda i: (i, 0)))

    in_specs = ([pl.BlockSpec(memory_space=pltpu.MemorySpace.SMEM),   # modifiers
                 pl.BlockSpec((tm, in_pad), lambda i: (i, 0))]        # lane-dense x tile
                + wb_specs)

    kernel = _build_mlp_kernel(n_hidden, return_hidden_activations, mm_dtype)
    results = pl.pallas_call(
        kernel,
        out_shape=tuple(out_shapes),
        grid=(num_tiles,),
        in_specs=in_specs,
        out_specs=tuple(out_specs),
        compiler_params=pltpu.CompilerParams(
            dimension_semantics=("parallel",),
            vmem_limit_bytes=vmem_limit),
    )(scale, x_p, *flat_wb)

    results = list(results) if isinstance(results, (list, tuple)) else [results]
    output = results[-1][:batch, :widths[-1]]
    if return_hidden_activations:
        hidden = [results[l][:batch, :widths[l]].astype(jnp.float32)
                  for l in range(n_hidden)]
    else:
        hidden = []
    activations = [x] + hidden + [output]
    return output, activations


def _torch_like_linear_init(key, in_features, out_features):
    """Deterministic init mimicking nn.Linear (uniform +/- 1/sqrt(fan_in))."""
    kw, kb = jax.random.split(key)
    bound = 1.0 / jnp.sqrt(jnp.asarray(in_features, jnp.float32))
    # Stored as (in, out): transpose of PyTorch's (out, in) weight.
    w = jax.random.uniform(kw, (in_features, out_features), jnp.float32,
                           minval=-bound, maxval=bound)
    b = jax.random.uniform(kb, (out_features,), jnp.float32,
                           minval=-bound, maxval=bound)
    return w, b


def _reference_forward(x, params, sensor_sensitivity, processing_speed):
    """Pure-JAX f32 reference reproducing the PyTorch forward exactly."""
    activations = [x]
    _ = x * sensor_sensitivity  # dead code in the reference module
    for (w, b) in params[:-1]:
        z = activations[-1] @ w + b
        z = z * processing_speed
        a = jnp.where(z > 0, z, 0.01 * z)
        activations.append(a)
    w, b = params[-1]
    z = activations[-1] @ w + b
    out = jax.nn.softmax(z, axis=-1)
    activations.append(out)
    return out, activations


if __name__ == "__main__":
    # Small shapes that still exercise batch tiling (grid of 2) and feature padding.
    batch = 200
    input_size = 16
    hidden_sizes = [48, 80]
    output_size = 10

    key = jax.random.PRNGKey(0)
    k_x, *k_layers = jax.random.split(key, 1 + len(hidden_sizes) + 1)
    x = jax.random.normal(k_x, (batch, input_size), jnp.float32)

    dims = [input_size] + hidden_sizes + [output_size]
    params = [_torch_like_linear_init(k_layers[i], dims[i], dims[i + 1])
              for i in range(len(dims) - 1)]

    gm = {"sensor_sensitivity": 1.3, "processing_speed": 0.9}

    ref_out, ref_acts = _reference_forward(
        x, params, gm["sensor_sensitivity"], gm["processing_speed"])

    # 1) f32 everywhere: tight parity check (exact softmax normalization).
    out32, acts32 = adaptive_nn_forward(
        x, params, gm["sensor_sensitivity"], gm["processing_speed"],
        matmul_dtype=jnp.float32, hidden_out_dtype=jnp.float32)
    jax.block_until_ready(out32)
    assert len(acts32) == len(ref_acts) == len(hidden_sizes) + 2
    for a, r in zip(acts32, ref_acts):
        assert a.shape == r.shape
        assert float(jnp.max(jnp.abs(a.astype(jnp.float32) - r))) < 2e-3
    assert float(jnp.max(jnp.abs(jnp.sum(out32, axis=-1) - 1.0))) < 1e-3

    # 2) default bf16 MXU + bf16 hidden writeback: looser tolerance.
    out16, acts16 = adaptive_nn_forward(
        x, params, gm["sensor_sensitivity"], gm["processing_speed"])
    jax.block_until_ready(out16)
    for a, r in zip(acts16, ref_acts):
        assert a.shape == r.shape
        assert float(jnp.max(jnp.abs(a.astype(jnp.float32) - r))) < 5e-2
    assert float(jnp.max(jnp.abs(jnp.sum(out16, axis=-1) - 1.0))) < 1e-2

    # 3) Inference path without hidden-activation writeback.
    out_fast, acts_fast = adaptive_nn_forward(
        x, params, gm["sensor_sensitivity"], gm["processing_speed"],
        return_hidden_activations=False)
    jax.block_until_ready(out_fast)
    assert out_fast.shape == ref_out.shape
    assert float(jnp.max(jnp.abs(out_fast - ref_out))) < 5e-2
    assert len(acts_fast) == 2  # [x, output]

    print("KERNEL_OK")
</pallas_src>

<mosaic_0001>
module attributes {stable_mosaic.version = 11 : i64} {
  func.func @kernel(%arg0: i32, %arg1: memref<2xf32, #tpu.memory_space<smem>>, %arg2: memref<128x128xf32, #tpu.memory_space<vmem>>, %arg3: memref<128x128xf32, #tpu.memory_space<vmem>>, %arg4: memref<1x128xf32, #tpu.memory_space<vmem>>, %arg5: memref<128x128xf32, #tpu.memory_space<vmem>>, %arg6: memref<1x128xf32, #tpu.memory_space<vmem>>, %arg7: memref<128x128xf32, #tpu.memory_space<vmem>>, %arg8: memref<1x128xf32, #tpu.memory_space<vmem>>, %arg9: memref<128x128xf32, #tpu.memory_space<vmem>>, %arg10: memref<128x128xf32, #tpu.memory_space<vmem>>, %arg11: memref<128x128xf32, #tpu.memory_space<vmem>>) attributes {dimension_semantics = [#tpu.dimension_semantics<parallel>], iteration_bounds = array<i64: 2>, scalar_prefetch = 0 : i64, scratch_operands = 0 : i64, tpu.core_type = #tpu.core_type<tc>, window_params = [{transform_indices = @transform_0, window_bounds = array<i64: 2>}, {transform_indices = @transform_1, window_bounds = array<i64: 128, 128>}, {pipeline_mode = #tpu.pipeline_mode<synchronous>, transform_indices = @transform_2, window_bounds = array<i64: 128, 128>}, {pipeline_mode = #tpu.pipeline_mode<synchronous>, transform_indices = @transform_3, window_bounds = array<i64: 1, 128>}, {pipeline_mode = #tpu.pipeline_mode<synchronous>, transform_indices = @transform_4, window_bounds = array<i64: 128, 128>}, {pipeline_mode = #tpu.pipeline_mode<synchronous>, transform_indices = @transform_5, window_bounds = array<i64: 1, 128>}, {pipeline_mode = #tpu.pipeline_mode<synchronous>, transform_indices = @transform_6, window_bounds = array<i64: 128, 128>}, {pipeline_mode = #tpu.pipeline_mode<synchronous>, transform_indices = @transform_7, window_bounds = array<i64: 1, 128>}, {transform_indices = @transform_8, window_bounds = array<i64: 128, 128>}, {transform_indices = @transform_9, window_bounds = array<i64: 128, 128>}, {transform_indices = @transform_10, window_bounds = array<i64: 128, 128>}]} {
    %c1 = arith.constant 1 : index
    %0 = memref.load %arg1[%c1] : memref<2xf32, #tpu.memory_space<smem>>
    %c0 = arith.constant 0 : index
    %c0_0 = arith.constant 0 : index
    %1 = vector.load %arg2[%c0, %c0_0] : memref<128x128xf32, #tpu.memory_space<vmem>>, vector<128x128xf32>
    %c0_1 = arith.constant 0 : index
    %c0_2 = arith.constant 0 : index
    %2 = vector.load %arg3[%c0_1, %c0_2] : memref<128x128xf32, #tpu.memory_space<vmem>>, vector<128x128xf32>
    %c0_3 = arith.constant 0 : index
    %c0_4 = arith.constant 0 : index
    %3 = vector.load %arg4[%c0_3, %c0_4] : memref<1x128xf32, #tpu.memory_space<vmem>>, vector<1x128xf32>
    %cst = arith.constant dense<0.000000e+00> : vector<128x128xf32>
    %4 = tpu.matmul %1, %2, %cst {dimension_numbers = #tpu.dot_dimension_numbers<[1], [0], [0], [1], [0, 0, 1, 1], [], []>} : vector<128x128xf32>, vector<128x128xf32>, vector<128x128xf32> -> vector<128x128xf32>
    %5 = vector.broadcast %3 : vector<1x128xf32> to vector<128x128xf32>
    %6 = arith.addf %4, %5 : vector<128x128xf32>
    %7 = vector.broadcast %0 : f32 to vector<128x128xf32>
    %8 = arith.mulf %6, %7 : vector<128x128xf32>
    %cst_5 = arith.constant 0.00999999977 : f32
    %9 = vector.broadcast %cst_5 : f32 to vector<128x128xf32>
    %10 = arith.mulf %9, %8 : vector<128x128xf32>
    %11 = arith.maximumf %8, %10 : vector<128x128xf32>
    %c0_6 = arith.constant 0 : index
    %c0_7 = arith.constant 0 : index
    %12 = vector.load %arg9[%c0_6, %c0_7] : memref<128x128xf32, #tpu.memory_space<vmem>>, vector<128x128xf32>
    tpu.vector_store %arg9[%c0_6, %c0_7], %11 {strides = array<i32>} : memref<128x128xf32, #tpu.memory_space<vmem>>, vector<128x128xf32>,
    %c0_8 = arith.constant 0 : index
    %c0_9 = arith.constant 0 : index
    %13 = vector.load %arg5[%c0_8, %c0_9] : memref<128x128xf32, #tpu.memory_space<vmem>>, vector<128x128xf32>
    %c0_10 = arith.constant 0 : index
    %c0_11 = arith.constant 0 : index
    %14 = vector.load %arg6[%c0_10, %c0_11] : memref<1x128xf32, #tpu.memory_space<vmem>>, vector<1x128xf32>
    %cst_12 = arith.constant dense<0.000000e+00> : vector<128x128xf32>
    %15 = tpu.matmul %11, %13, %cst_12 {dimension_numbers = #tpu.dot_dimension_numbers<[1], [0], [0], [1], [0, 0, 1, 1], [], []>} : vector<128x128xf32>, vector<128x128xf32>, vector<128x128xf32> -> vector<128x128xf32>
    %16 = vector.broadcast %14 : vector<1x128xf32> to vector<128x128xf32>
    %17 = arith.addf %15, %16 : vector<128x128xf32>
    %18 = vector.broadcast %0 : f32 to vector<128x128xf32>
    %19 = arith.mulf %17, %18 : vector<128x128xf32>
    %cst_13 = arith.constant 0.00999999977 : f32
    %20 = vector.broadcast %cst_13 : f32 to vector<128x128xf32>
    %21 = arith.mulf %20, %19 : vector<128x128xf32>
    %22 = arith.maximumf %19, %21 : vector<128x128xf32>
    %c0_14 = arith.constant 0 : index
    %c0_15 = arith.constant 0 : index
    %23 = vector.load %arg10[%c0_14, %c0_15] : memref<128x128xf32, #tpu.memory_space<vmem>>, vector<128x128xf32>
    tpu.vector_store %arg10[%c0_14, %c0_15], %22 {strides = array<i32>} : memref<128x128xf32, #tpu.memory_space<vmem>>, vector<128x128xf32>,
    %c0_16 = arith.constant 0 : index
    %c0_17 = arith.constant 0 : index
    %24 = vector.load %arg7[%c0_16, %c0_17] : memref<128x128xf32, #tpu.memory_space<vmem>>, vector<128x128xf32>
    %c0_18 = arith.constant 0 : index
    %c0_19 = arith.constant 0 : index
    %25 = vector.load %arg8[%c0_18, %c0_19] : memref<1x128xf32, #tpu.memory_space<vmem>>, vector<1x128xf32>
    %cst_20 = arith.constant dense<0.000000e+00> : vector<128x128xf32>
    %26 = tpu.matmul %22, %24, %cst_20 {dimension_numbers = #tpu.dot_dimension_numbers<[1], [0], [0], [1], [0, 0, 1, 1], [], []>} : vector<128x128xf32>, vector<128x128xf32>, vector<128x128xf32> -> vector<128x128xf32>
    %27 = vector.broadcast %25 : vector<1x128xf32> to vector<128x128xf32>
    %28 = arith.addf %26, %27 : vector<128x128xf32>
    %cst_21 = arith.constant dense<0xFF800000> : vector<128xf32>
    %29 = vector.multi_reduction <maximumf>, %28, %cst_21 [1] : vector<128x128xf32> to vector<128xf32>
    %30 = vector.shape_cast %29 : vector<128xf32> to vector<128x1xf32>
    %31 = vector.broadcast %30 : vector<128x1xf32> to vector<128x128xf32>
    %32 = arith.subf %28, %31 : vector<128x128xf32>
    %33 = math.exp %32 : vector<128x128xf32>
    %cst_22 = arith.constant dense<0.000000e+00> : vector<128xf32>
    %34 = vector.multi_reduction <add>, %33, %cst_22 [1] : vector<128x128xf32> to vector<128xf32>
    %35 = vector.shape_cast %34 : vector<128xf32> to vector<128x1xf32>
    %36 = vector.broadcast %35 : vector<128x1xf32> to vector<128x128xf32>
    %37 = arith.divf %33, %36 : vector<128x128xf32>
    %c0_23 = arith.constant 0 : index
    %c0_24 = arith.constant 0 : index
    %38 = vector.load %arg11[%c0_23, %c0_24] : memref<128x128xf32, #tpu.memory_space<vmem>>, vector<128x128xf32>
    tpu.vector_store %arg11[%c0_23, %c0_24], %37 {strides = array<i32>} : memref<128x128xf32, #tpu.memory_space<vmem>>, vector<128x128xf32>,
    return
  }
  func.func @transform_0(%arg0: i32) -> i32 {
    %c0_i32 = arith.constant 0 : i32
    %c0_i32_0 = arith.constant 0 : i32
    return %c0_i32 : i32
  }
  func.func @transform_1(%arg0: i32) -> (i32, i32) {
    %c0_i32 = arith.constant 0 : i32
    %c0_i32_0 = arith.constant 0 : i32
    return %arg0, %c0_i32 : i32, i32
  }
  func.func @transform_2(%arg0: i32) -> (i32, i32) {
    %c0_i32 = arith.constant 0 : i32
    %c0_i32_0 = arith.constant 0 : i32
    %c0_i32_1 = arith.constant 0 : i32
    return %c0_i32, %c0_i32_0 : i32, i32
  }
  func.func @transform_3(%arg0: i32) -> (i32, i32) {
    %c0_i32 = arith.constant 0 : i32
    %c0_i32_0 = arith.constant 0 : i32
    %c0_i32_1 = arith.constant 0 : i32
    return %c0_i32, %c0_i32_0 : i32, i32
  }
  func.func @transform_4(%arg0: i32) -> (i32, i32) {
    %c0_i32 = arith.constant 0 : i32
    %c0_i32_0 = arith.constant 0 : i32
    %c0_i32_1 = arith.constant 0 : i32
    return %c0_i32, %c0_i32_0 : i32, i32
  }
  func.func @transform_5(%arg0: i32) -> (i32, i32) {
    %c0_i32 = arith.constant 0 : i32
    %c0_i32_0 = arith.constant 0 : i32
    %c0_i32_1 = arith.constant 0 : i32
    return %c0_i32, %c0_i32_0 : i32, i32
  }
  func.func @transform_6(%arg0: i32) -> (i32, i32) {
    %c0_i32 = arith.constant 0 : i32
    %c0_i32_0 = arith.constant 0 : i32
    %c0_i32_1 = arith.constant 0 : i32
    return %c0_i32, %c0_i32_0 : i32, i32
  }
  func.func @transform_7(%arg0: i32) -> (i32, i32) {
    %c0_i32 = arith.constant 0 : i32
    %c0_i32_0 = arith.constant 0 : i32
    %c0_i32_1 = arith.constant 0 : i32
    return %c0_i32, %c0_i32_0 : i32, i32
  }
  func.func @transform_8(%arg0: i32) -> (i32, i32) {
    %c0_i32 = arith.constant 0 : i32
    %c0_i32_0 = arith.constant 0 : i32
    return %arg0, %c0_i32 : i32, i32
  }
  func.func @transform_9(%arg0: i32) -> (i32, i32) {
    %c0_i32 = arith.constant 0 : i32
    %c0_i32_0 = arith.constant 0 : i32
    return %arg0, %c0_i32 : i32, i32
  }
  func.func @transform_10(%arg0: i32) -> (i32, i32) {
    %c0_i32 = arith.constant 0 : i32
    %c0_i32_0 = arith.constant 0 : i32
    return %arg0, %c0_i32 : i32, i32
  }
}

</mosaic_0001>

<bundles_post_ra>
// kernel: adaptive_nn_forward.1
= control target key start
LH: loop header
LB: loop body
LE: loop exit
PB: predicated region body
PF: predicated region fallthrough
CT: control target
= control target key end

     0   :  { %16 = vsyncpa [#allocation3], 0  ;;  %s1544_s13 = smov 0   ;;  %s1990_s0 = inlined_call_operand.vmem [shape: f32[2], index: 0, kind: input, shape index: {}]   ;;  %s1991_s1 = inlined_call_operand.vmem [shape: f32[256,128], index: 1, kind: input, shape index: {}]   ;;  %s1992_s2 = inlined_call_operand.vmem [shape: f32[128,128], index: 2, kind: input, shape index: {}]   ;;  %s1993_s3 = inlined_call_operand.vmem [shape: f32[1,128], index: 3, kind: input, shape index: {}]   ;;  %s1994_s4 = inlined_call_operand.vmem [shape: f32[128,128], index: 4, kind: input, shape index: {}]   ;;  %s1995_s5 = inlined_call_operand.vmem [shape: f32[1,128], index: 5, kind: input, shape index: {}]   ;;  %s1996_s6 = inlined_call_operand.vmem [shape: f32[128,128], index: 6, kind: input, shape index: {}]   ;;  %s1997_s7 = inlined_call_operand.vmem [shape: f32[1,128], index: 7, kind: input, shape index: {}]   ;;  %s1998_s8 = inlined_call_operand.vmem [shape: f32[256,128], index: 8, kind: output, shape index: {0}]   ;;  %s1999_s9 = inlined_call_operand.vmem [shape: f32[256,128], index: 9, kind: output, shape index: {1}]   ;;  %s2000_s10 = inlined_call_operand.vmem [shape: f32[256,128], index: 10, kind: output, shape index: {2}]  }
   0x1 LB: > { %s1309_s14 = sadd.s32 4294967295, %s1486_s13   ;;  %p1311_p0 = scmp.ge.s32.totalorder %s1486_s13, 1  ;;  %s1486_s13 = sphi %s1544_s13, %s22_s13  }
   0x2   : > { %p278_p1 = scmp.lt.s32.totalorder %s1486_s13, 3  ;;  %s290_s17 = sshll.u32 %s1990_s0, 4  ;;  %s291_s17 = int_to_ptr.vmem [resolvable:$true] %s290_s17 }
   0x3   : > { %p1383_p3 = scmp.eq.s32.totalorder %s1309_s14, 0  ;;  %s1488_s18 = smov [#allocation2]  }
   0x4   : > { %p279_p2 = pnand %p1311_p0, %p278_p1 }
   0x6   : > { %p1379_p4 = pneg %p279_p2  ;;  %330 = sbr.rel (%p279_p2) target bundleno = 807 (0x327), region = 52 }
   0x8   : > { %p1380_p5 = pnand %p1383_p3, %p1379_p4 }
   0xa   : > { %1382 = dma.vmem_to_smem (!%p1380_p5), %s291_s17, 16, %s1488_s18, [#allocation3]  }
   0xb   : > { %1481 = dma.done.wait (%p1383_p3), [#allocation3], 16  }
   0xc   : > { %1483 = vsyncadd (%p1383_p3), [#allocation3], 4294967280 }
   0xd   : > { %337 = sfence }
   0xe   : > { %v436_v0 = vld [vmem:[%s1992_s2 + $0x78] sm:$0xff]  ;;  %v435_v1 = vld [vmem:[%s1992_s2 + $0x70] sm:$0xff]  ;;  %v434_v2 = vld [vmem:[%s1992_s2 + $0x68] sm:$0xff]  ;;  %s1316_s17 = sshll.u32 %s1309_s14, 4  ;;  %s1324_s15 = sld [smem:[#allocation2 + $0x1]] }
   0xf   : > { %441 = vmatpush.msra.mxu0 %v436_v0  ;;  %1327 = vmatpush.msra.mxu3 %v436_v0  ;;  %v433_v3 = vld [vmem:[%s1992_s2 + $0x60] sm:$0xff]  ;;  %v432_v4 = vld [vmem:[%s1992_s2 + $0x58] sm:$0xff]  ;;  %v431_v5 = vld [vmem:[%s1992_s2 + $0x50] sm:$0xff]  ;;  %p381_p6 = scmp.lt.s32.totalorder %s1316_s17, 31 }
  0x10   : > { %v430_v6 = vld [vmem:[%s1992_s2 + $0x48] sm:$0xff]  ;;  %v429_v7 = vld [vmem:[%s1992_s2 + $0x40] sm:$0xff]  ;;  %v428_v8 = vld [vmem:[%s1992_s2 + $0x38] sm:$0xff] }
  0x11   : > { %442 = vmatpush.msra.mxu0 %v435_v1  ;;  %1328 = vmatpush.msra.mxu3 %v435_v1  ;;  %v427_v9 = vld [vmem:[%s1992_s2 + $0x30] sm:$0xff]  ;;  %v426_v10 = vld [vmem:[%s1992_s2 + $0x28] sm:$0xff]  ;;  %s2002_s17 = smov (!%p381_p6, %s1316_s17), 31  ;;  %v425_v11 = vld [vmem:[%s1992_s2 + $0x20] sm:$0xff] }
  0x12   : > { %v424_v12 = vld [vmem:[%s1992_s2 + $0x18] sm:$0xff]  ;;  %s1598_s27 = sshll.u32 %s2002_s17, 3  ;;  %v423_v13 = vld [vmem:[%s1992_s2 + $0x10] sm:$0xff]  ;;  %v422_v14 = vld [vmem:[%s1992_s2 + $0x8] sm:$0xff] }
  0x13   : > { %443 = vmatpush.msra.mxu0 %v434_v2  ;;  %1329 = vmatpush.msra.mxu3 %v434_v2  ;;  %s1610_s16 = scalar_lea.vmem %s1991_s1, %s1598_s27  ;;  %v421_v15 = vld [vmem:[%s1992_s2] sm:$0xff]  ;;  %v586_v28 = vld [vmem:[%s1994_s4 + $0x78] sm:$0xff]  ;;  %v585_v29 = vld [vmem:[%s1994_s4 + $0x70] sm:$0xff]  ;;  %s1692_s21 = scalar_lea.vmem %s1998_s8, %s1598_s27 }
  0x14   : > { %v405_v16 = vld [vmem:[%s1610_s16] sm:$0xff]  ;;  %v406_v18 = vld [vmem:[%s1610_s16 + $0x8] sm:$0xff]  ;;  %v407_v19 = vld [vmem:[%s1610_s16 + $0x10] sm:$0xff]  ;;  %591 = vmatpush.msra.mxu1 %v586_v28  ;;  %v1684_v50 = vstv %s1324_s15  ;;  %s1799_s23 = scalar_lea.vmem %s1999_s9, %s1598_s27  ;;  %s1946_s28 = scalar_lea.vmem %s2000_s10, %s1598_s27 }
  0x15   : > { %444 = vmatpush.msra.mxu0 %v433_v3  ;;  %1330 = vmatpush.msra.mxu3 %v433_v3  ;;  %v417_v17 = vld [vmem:[%s1610_s16 + $0x60] sm:$0xff]  ;;  %v418_v20 = vld [vmem:[%s1610_s16 + $0x68] sm:$0xff]  ;;  %v408_v21 = vld [vmem:[%s1610_s16 + $0x18] sm:$0xff] }
  0x16   : > { %v419_v22 = vld [vmem:[%s1610_s16 + $0x70] sm:$0xff]  ;;  %v409_v23 = vld [vmem:[%s1610_s16 + $0x20] sm:$0xff]  ;;  %v420_v24 = vld [vmem:[%s1610_s16 + $0x78] sm:$0xff]  ;;  %592 = vmatpush.msra.mxu1 %v585_v29 }
  0x17   : > { %445 = vmatpush.msra.mxu0 %v432_v4  ;;  %1331 = vmatpush.msra.mxu3 %v432_v4  ;;  %v410_v25 = vld [vmem:[%s1610_s16 + $0x28] sm:$0xff]  ;;  %v411_v26 = vld [vmem:[%s1610_s16 + $0x30] sm:$0xff]  ;;  %v412_v27 = vld [vmem:[%s1610_s16 + $0x38] sm:$0xff] }
  0x18   : > { %v584_v30 = vld [vmem:[%s1994_s4 + $0x68] sm:$0xff]  ;;  %v583_v31 = vld [vmem:[%s1994_s4 + $0x60] sm:$0xff]  ;;  %v582_v33 = vld [vmem:[%s1994_s4 + $0x58] sm:$0xff] }
  0x19   : > { %446 = vmatpush.msra.mxu0 %v431_v5  ;;  %1332 = vmatpush.msra.mxu3 %v431_v5  ;;  %v413_v32 = vld [vmem:[%s1610_s16 + $0x40] sm:$0xff]  ;;  %v581_v34 = vld [vmem:[%s1994_s4 + $0x50] sm:$0xff]  ;;  %v580_v35 = vld [vmem:[%s1994_s4 + $0x48] sm:$0xff] }
  0x1a   : > { %593 = vmatpush.msra.mxu1 %v584_v30  ;;  %v579_v36 = vld [vmem:[%s1994_s4 + $0x40] sm:$0xff]  ;;  %v414_v37 = vld [vmem:[%s1610_s16 + $0x48] sm:$0xff]  ;;  %v578_v38 = vld [vmem:[%s1994_s4 + $0x38] sm:$0xff] }
  0x1b   : > { %447 = vmatpush.msra.mxu0 %v430_v6  ;;  %1333 = vmatpush.msra.mxu3 %v430_v6  ;;  %v577_v39 = vld [vmem:[%s1994_s4 + $0x30] sm:$0xff]  ;;  %v576_v40 = vld [vmem:[%s1994_s4 + $0x28] sm:$0xff]  ;;  %v416_v42 = vld [vmem:[%s1610_s16 + $0x58] sm:$0xff] }
  0x1c   : > { %594 = vmatpush.msra.mxu1 %v583_v31  ;;  %v415_v41 = vld [vmem:[%s1610_s16 + $0x50] sm:$0xff]  ;;  %v575_v43 = vld [vmem:[%s1994_s4 + $0x20] sm:$0xff]  ;;  %v574_v44 = vld [vmem:[%s1994_s4 + $0x18] sm:$0xff] }
  0x1d   : > { %448 = vmatpush.msra.mxu0 %v429_v7  ;;  %1334 = vmatpush.msra.mxu3 %v429_v7  ;;  %v573_v45 = vld [vmem:[%s1994_s4 + $0x10] sm:$0xff]  ;;  %v572_v46 = vld [vmem:[%s1994_s4 + $0x8] sm:$0xff]  ;;  %v571_v47 = vld [vmem:[%s1994_s4] sm:$0xff] }
  0x1e   : > { %595 = vmatpush.msra.mxu1 %v582_v33  ;;  %v1682_v48 = vld [vmem:[%s1993_s3] ss:$0 sm:$0xff] }
  0x1f   : > { %449 = vmatpush.msra.mxu0 %v428_v8  ;;  %1335 = vmatpush.msra.mxu3 %v428_v8 }
  0x20   : > { %596 = vmatpush.msra.mxu1 %v581_v34 }
  0x21   : > { %450 = vmatpush.msra.mxu0 %v427_v9  ;;  %1336 = vmatpush.msra.mxu3 %v427_v9 }
  0x22   : > { %597 = vmatpush.msra.mxu1 %v580_v35 }
  0x23   : > { %451 = vmatpush.msra.mxu0 %v426_v10  ;;  %1337 = vmatpush.msra.mxu3 %v426_v10 }
  0x24   : > { %598 = vmatpush.msra.mxu1 %v579_v36 }
  0x25   : > { %452 = vmatpush.msra.mxu0 %v425_v11  ;;  %1338 = vmatpush.msra.mxu3 %v425_v11 }
  0x26   : > { %599 = vmatpush.msra.mxu1 %v578_v38 }
  0x27   : > { %453 = vmatpush.msra.mxu0 %v424_v12  ;;  %1339 = vmatpush.msra.mxu3 %v424_v12 }
  0x28   : > { %600 = vmatpush.msra.mxu1 %v577_v39 }
  0x29   : > { %454 = vmatpush.msra.mxu0 %v423_v13  ;;  %1340 = vmatpush.msra.mxu3 %v423_v13 }
  0x2a   : > { %601 = vmatpush.msra.mxu1 %v576_v40 }
  0x2b   : > { %455 = vmatpush.msra.mxu0 %v422_v14  ;;  %1341 = vmatpush.msra.mxu3 %v422_v14 }
  0x2c   : > { %602 = vmatpush.msra.mxu1 %v575_v43 }
  0x2d   : > { %456 = vmatpush.msra.mxu0 %v421_v15  ;;  %1342 = vmatpush.msra.mxu3 %v421_v15 }
  0x2e   : > { %457 = vmatmul.f32.vlgmr.msra.gmra.mxu0 %v405_v16  ;;  %493 = vmatmul.f32.vlgmr.msra.gmra.mxu3 %v417_v17 }
  0x2f   : > { %1343 = vmatpush.msrb.mxu3 %v586_v28  ;;  %603 = vmatpush.msra.mxu1 %v574_v44 }
  0x31   : > { %1344 = vmatpush.msrb.mxu3 %v585_v29  ;;  %604 = vmatpush.msra.mxu1 %v573_v45 }
  0x33   : > { %1345 = vmatpush.msrb.mxu3 %v584_v30  ;;  %605 = vmatpush.msra.mxu1 %v572_v46 }
  0x35   : > { %1346 = vmatpush.msrb.mxu3 %v583_v31  ;;  %606 = vmatpush.msra.mxu1 %v571_v47 }
  0x36   : > { %460 = vmatmul.f32.gmra.mxu0 %v406_v18  ;;  %496 = vmatmul.f32.gmra.mxu3 %v418_v20 }
  0x37   : > { %1347 = vmatpush.msrb.mxu3 %v582_v33 }
  0x39   : > { %1348 = vmatpush.msrb.mxu3 %v581_v34 }
  0x3b   : > { %1349 = vmatpush.msrb.mxu3 %v580_v35 }
  0x3d   : > { %1350 = vmatpush.msrb.mxu3 %v579_v36 }
  0x3e   : > { %463 = vmatmul.f32.gmra.mxu0 %v407_v19  ;;  %499 = vmatmul.f32.gmra.mxu3 %v419_v22 }
  0x3f   : > { %1351 = vmatpush.msrb.mxu3 %v578_v38 }
  0x41   : > { %1352 = vmatpush.msrb.mxu3 %v577_v39 }
  0x43   : > { %1353 = vmatpush.msrb.mxu3 %v576_v40 }
  0x45   : > { %1354 = vmatpush.msrb.mxu3 %v575_v43 }
  0x46   : > { %466 = vmatmul.f32.gmra.mxu0 %v408_v21  ;;  %502 = vmatmul.f32.gmra.mxu3 %v420_v24 }
  0x47   : > { %1355 = vmatpush.msrb.mxu3 %v574_v44 }
  0x49   : > { %1356 = vmatpush.msrb.mxu3 %v573_v45 }
  0x4b   : > { %1357 = vmatpush.msrb.mxu3 %v572_v46 }
  0x4d   : > { %1358 = vmatpush.msrb.mxu3 %v571_v47 }
  0x4e   : > { %469 = vmatmul.f32.gmra.mxu0 %v409_v23 }
  0x56   : > { %472 = vmatmul.f32.gmra.mxu0 %v410_v25 }
  0x5e   : > { %475 = vmatmul.f32.gmra.mxu0 %v411_v26 }
  0x66   : > { %478 = vmatmul.f32.gmra.mxu0 %v412_v27 }
  0x6e   : > { %481 = vmatmul.f32.gmra.mxu0 %v413_v32 }
  0x76   : > { %484 = vmatmul.f32.gmra.mxu0 %v414_v37 }
  0x7e   : > { %487 = vmatmul.f32.gmra.mxu0 %v415_v41 }
  0x86   : > { %490 = vmatmul.f32.gmra.mxu0 %v416_v42 }
  0xab   : > { %v458_v49 = vpop.f32.mrf.mxu0 }
  0xac   : > { %v459_v51 = vadd.f32 %v1682_v48, %v458_v49  ;;  %v735_v49 = vld [vmem:[%s1996_s6 + $0x78] sm:$0xff] }
  0xad   : > { %740 = vmatpush.msra.mxu2 %v735_v49  ;;  %1359 = vmatpush.msra.mxu3 %v735_v49 }
  0xae   : > { %v507_v52 = vmul.f32 %v1684_v50, %v459_v51  ;;  %v734_v51 = vld [vmem:[%s1996_s6 + $0x70] sm:$0xff] }
  0xaf   : > { %741 = vmatpush.msra.mxu2 %v734_v51  ;;  %1360 = vmatpush.msra.mxu3 %v734_v51 }
  0xb0   : > { %v523_v53 = vmul.f32 0.01, %v507_v52 }
  0xb1   : > { %v494_v54 = vpop.f32.mrf.mxu3 }
  0xb2   : > { %v539_v55 = vmax.f32 %v507_v52, %v523_v53  ;;  %v495_v56 = vadd.f32 %v1682_v48, %v494_v54  ;;  %v733_v53 = vld [vmem:[%s1996_s6 + $0x68] sm:$0xff] }
  0xb3   : > { %v461_v57 = vpop.f32.mrf.mxu0  ;;  %742 = vmatpush.msra.mxu2 %v733_v53  ;;  %1361 = vmatpush.msra.mxu3 %v733_v53 }
  0xb4   : > { %v462_v58 = vadd.f32 %v1682_v48, %v461_v57  ;;  %555 = vst [vmem:[%s1692_s21] sm:$0xff] %v539_v55  ;;  %607 = vmatmul.f32.vlgmr.msra.gmra.mxu1 %v539_v55  ;;  %v519_v59 = vmul.f32 %v1684_v50, %v495_v56  ;;  %v732_v55 = vld [vmem:[%s1996_s6 + $0x60] sm:$0xff]  ;;  %v731_v57 = vld [vmem:[%s1996_s6 + $0x58] sm:$0xff] }
  0xb5   : > { %743 = vmatpush.msra.mxu2 %v732_v55  ;;  %1362 = vmatpush.msra.mxu3 %v732_v55 }
  0xb6   : > { %v508_v60 = vmul.f32 %v1684_v50, %v462_v58  ;;  %v535_v61 = vmul.f32 0.01, %v519_v59 }
  0xb7   : > { %744 = vmatpush.msra.mxu2 %v731_v57  ;;  %1363 = vmatpush.msra.mxu3 %v731_v57 }
  0xb8   : > { %v524_v62 = vmul.f32 0.01, %v508_v60  ;;  %v551_v63 = vmax.f32 %v519_v59, %v535_v61 }
  0xb9   : > { %v497_v8 = vpop.f32.mrf.mxu3 }
  0xba   : > { %v540_v0 = vmax.f32 %v508_v60, %v524_v62  ;;  %567 = vst [vmem:[%s1692_s21 + $0x60] sm:$0xff] %v551_v63  ;;  %643 = vmatmul.f32.vlgmr.msrb.gmra.mxu3 %v551_v63  ;;  %v498_v10 = vadd.f32 %v1682_v48, %v497_v8  ;;  %v730_v60 = vld [vmem:[%s1996_s6 + $0x50] sm:$0xff]  ;;  %v729_v62 = vld [vmem:[%s1996_s6 + $0x48] sm:$0xff] }
  0xbb   : > { %v464_v1 = vpop.f32.mrf.mxu0  ;;  %745 = vmatpush.msra.mxu2 %v730_v60  ;;  %1364 = vmatpush.msra.mxu3 %v730_v60 }
  0xbc   : > { %v465_v2 = vadd.f32 %v1682_v48, %v464_v1  ;;  %556 = vst [vmem:[%s1692_s21 + $0x8] sm:$0xff] %v540_v0  ;;  %610 = vmatmul.f32.gmra.mxu1 %v540_v0  ;;  %v520_v12 = vmul.f32 %v1684_v50, %v498_v10  ;;  %v728_v0 = vld [vmem:[%s1996_s6 + $0x40] sm:$0xff] }
  0xbd   : > { %746 = vmatpush.msra.mxu2 %v729_v62  ;;  %1365 = vmatpush.msra.mxu3 %v729_v62 }
  0xbe   : > { %v509_v3 = vmul.f32 %v1684_v50, %v465_v2  ;;  %v536_v14 = vmul.f32 0.01, %v520_v12  ;;  %v727_v2 = vld [vmem:[%s1996_s6 + $0x38] sm:$0xff] }
  0xbf   : > { %747 = vmatpush.msra.mxu2 %v728_v0  ;;  %1366 = vmatpush.msra.mxu3 %v728_v0 }
  0xc0   : > { %v525_v4 = vmul.f32 0.01, %v509_v3  ;;  %v552_v17 = vmax.f32 %v520_v12, %v536_v14 }
  0xc1   : > { %v500_v18 = vpop.f32.mrf.mxu3  ;;  %748 = vmatpush.msra.mxu2 %v727_v2  ;;  %1367 = vmatpush.msra.mxu3 %v727_v2 }
  0xc2   : > { %v541_v5 = vmax.f32 %v509_v3, %v525_v4  ;;  %v501_v20 = vadd.f32 %v1682_v48, %v500_v18  ;;  %568 = vst [vmem:[%s1692_s21 + $0x68] sm:$0xff] %v552_v17  ;;  %646 = vmatmul.f32.gmra.mxu3 %v552_v17  ;;  %v721_v17 = vld [vmem:[%s1996_s6 + $0x8] sm:$0xff]  ;;  %v720_v18 = vld [vmem:[%s1996_s6] sm:$0xff] }
  0xc3   : > { %v467_v6 = vpop.f32.mrf.mxu0 }
  0xc4   : > { %v468_v7 = vadd.f32 %v1682_v48, %v467_v6  ;;  %557 = vst [vmem:[%s1692_s21 + $0x10] sm:$0xff] %v541_v5  ;;  %613 = vmatmul.f32.gmra.mxu1 %v541_v5  ;;  %v521_v22 = vmul.f32 %v1684_v50, %v501_v20  ;;  %v726_v5 = vld [vmem:[%s1996_s6 + $0x30] sm:$0xff] }
  0xc5   : > { %749 = vmatpush.msra.mxu2 %v726_v5  ;;  %1368 = vmatpush.msra.mxu3 %v726_v5 }
  0xc6   : > { %v510_v9 = vmul.f32 %v1684_v50, %v468_v7  ;;  %v537_v24 = vmul.f32 0.01, %v521_v22  ;;  %v725_v7 = vld [vmem:[%s1996_s6 + $0x28] sm:$0xff] }
  0xc7   : > { %750 = vmatpush.msra.mxu2 %v725_v7  ;;  %1369 = vmatpush.msra.mxu3 %v725_v7 }
  0xc8   : > { %v526_v11 = vmul.f32 0.01, %v510_v9  ;;  %v553_v27 = vmax.f32 %v521_v22, %v537_v24 }
  0xc9   : > { %v503_v28 = vpop.f32.mrf.mxu3 }
  0xca   : > { %v542_v13 = vmax.f32 %v510_v9, %v526_v11  ;;  %v504_v30 = vadd.f32 %v1682_v48, %v503_v28  ;;  %569 = vst [vmem:[%s1692_s21 + $0x70] sm:$0xff] %v553_v27  ;;  %649 = vmatmul.f32.gmra.mxu3 %v553_v27 }
  0xcb   : > { %v470_v15 = vpop.f32.mrf.mxu0 }
  0xcc   : > { %v471_v16 = vadd.f32 %v1682_v48, %v470_v15  ;;  %558 = vst [vmem:[%s1692_s21 + $0x18] sm:$0xff] %v542_v13  ;;  %616 = vmatmul.f32.gmra.mxu1 %v542_v13  ;;  %v522_v32 = vmul.f32 %v1684_v50, %v504_v30  ;;  %v724_v15 = vld [vmem:[%s1996_s6 + $0x20] sm:$0xff] }
  0xcd   : > { %751 = vmatpush.msra.mxu2 %v724_v15  ;;  %1370 = vmatpush.msra.mxu3 %v724_v15 }
  0xce   : > { %v511_v19 = vmul.f32 %v1684_v50, %v471_v16  ;;  %v538_v34 = vmul.f32 0.01, %v522_v32  ;;  %v723_v16 = vld [vmem:[%s1996_s6 + $0x18] sm:$0xff] }
  0xcf   : > { %752 = vmatpush.msra.mxu2 %v723_v16  ;;  %1371 = vmatpush.msra.mxu3 %v723_v16 }
  0xd0   : > { %v527_v21 = vmul.f32 0.01, %v511_v19  ;;  %v554_v37 = vmax.f32 %v522_v32, %v538_v34 }
  0xd2   : > { %v543_v23 = vmax.f32 %v511_v19, %v527_v21  ;;  %570 = vst [vmem:[%s1692_s21 + $0x78] sm:$0xff] %v554_v37  ;;  %652 = vmatmul.f32.gmra.mxu3 %v554_v37  ;;  %v1791_v19 = vld [vmem:[%s1995_s5] ss:$0 sm:$0xff] }
  0xd3   : > { %v473_v25 = vpop.f32.mrf.mxu0 }
  0xd4   : > { %v474_v26 = vadd.f32 %v1682_v48, %v473_v25  ;;  %559 = vst [vmem:[%s1692_s21 + $0x20] sm:$0xff] %v543_v23  ;;  %619 = vmatmul.f32.gmra.mxu1 %v543_v23 }
  0xd6   : > { %v512_v29 = vmul.f32 %v1684_v50, %v474_v26 }
  0xd8   : > { %v528_v31 = vmul.f32 0.01, %v512_v29 }
  0xda   : > { %v544_v33 = vmax.f32 %v512_v29, %v528_v31 }
  0xdb   : > { %v476_v35 = vpop.f32.mrf.mxu0 }
  0xdc   : > { %v477_v36 = vadd.f32 %v1682_v48, %v476_v35  ;;  %560 = vst [vmem:[%s1692_s21 + $0x28] sm:$0xff] %v544_v33  ;;  %622 = vmatmul.f32.gmra.mxu1 %v544_v33 }
  0xde   : > { %v513_v38 = vmul.f32 %v1684_v50, %v477_v36 }
  0xe0   : > { %v529_v39 = vmul.f32 0.01, %v513_v38 }
  0xe2   : > { %v545_v40 = vmax.f32 %v513_v38, %v529_v39 }
  0xe3   : > { %v479_v41 = vpop.f32.mrf.mxu0 }
  0xe4   : > { %v480_v42 = vadd.f32 %v1682_v48, %v479_v41  ;;  %561 = vst [vmem:[%s1692_s21 + $0x30] sm:$0xff] %v545_v40  ;;  %625 = vmatmul.f32.gmra.mxu1 %v545_v40 }
  0xe6   : > { %v514_v43 = vmul.f32 %v1684_v50, %v480_v42 }
  0xe8   : > { %v530_v44 = vmul.f32 0.01, %v514_v43 }
  0xea   : > { %v546_v45 = vmax.f32 %v514_v43, %v530_v44 }
  0xeb   : > { %v482_v46 = vpop.f32.mrf.mxu0 }
  0xec   : > { %v483_v47 = vadd.f32 %v1682_v48, %v482_v46  ;;  %562 = vst [vmem:[%s1692_s21 + $0x38] sm:$0xff] %v546_v45  ;;  %628 = vmatmul.f32.gmra.mxu1 %v546_v45 }
  0xee   : > { %v515_v52 = vmul.f32 %v1684_v50, %v483_v47 }
  0xf0   : > { %v531_v54 = vmul.f32 0.01, %v515_v52 }
  0xf2   : > { %v547_v56 = vmax.f32 %v515_v52, %v531_v54 }
  0xf3   : > { %v485_v58 = vpop.f32.mrf.mxu0 }
  0xf4   : > { %v486_v59 = vadd.f32 %v1682_v48, %v485_v58  ;;  %563 = vst [vmem:[%s1692_s21 + $0x40] sm:$0xff] %v547_v56  ;;  %631 = vmatmul.f32.gmra.mxu1 %v547_v56 }
  0xf6   : > { %v516_v61 = vmul.f32 %v1684_v50, %v486_v59 }
  0xf8   : > { %v532_v63 = vmul.f32 0.01, %v516_v61 }
  0xfa   : > { %v548_v1 = vmax.f32 %v516_v61, %v532_v63 }
  0xfb   : > { %v488_v3 = vpop.f32.mrf.mxu0 }
  0xfc   : > { %v489_v4 = vadd.f32 %v1682_v48, %v488_v3  ;;  %564 = vst [vmem:[%s1692_s21 + $0x48] sm:$0xff] %v548_v1  ;;  %634 = vmatmul.f32.gmra.mxu1 %v548_v1 }
  0xfe   : > { %v517_v6 = vmul.f32 %v1684_v50, %v489_v4 }
 0x100   : > { %v533_v8 = vmul.f32 0.01, %v517_v6 }
 0x102   : > { %v549_v9 = vmax.f32 %v517_v6, %v533_v8 }
 0x103   : > { %v491_v10 = vpop.f32.mrf.mxu0 }
 0x104   : > { %v492_v11 = vadd.f32 %v1682_v48, %v491_v10  ;;  %565 = vst [vmem:[%s1692_s21 + $0x50] sm:$0xff] %v549_v9  ;;  %637 = vmatmul.f32.gmra.mxu1 %v549_v9  ;;  %v722_v48 = vld [vmem:[%s1996_s6 + $0x10] sm:$0xff] }
 0x105   : > { %753 = vmatpush.msra.mxu2 %v722_v48  ;;  %1372 = vmatpush.msra.mxu3 %v722_v48 }
 0x106   : > { %v518_v12 = vmul.f32 %v1684_v50, %v492_v11 }
 0x107   : > { %754 = vmatpush.msra.mxu2 %v721_v17  ;;  %1373 = vmatpush.msra.mxu3 %v721_v17 }
 0x108   : > { %v534_v13 = vmul.f32 0.01, %v518_v12 }
 0x109   : > { %755 = vmatpush.msra.mxu2 %v720_v18  ;;  %1374 = vmatpush.msra.mxu3 %v720_v18 }
 0x10a   : > { %v550_v14 = vmax.f32 %v518_v12, %v534_v13 }
 0x10c   : > { %566 = vst [vmem:[%s1692_s21 + $0x58] sm:$0xff] %v550_v14  ;;  %640 = vmatmul.f32.gmra.mxu1 %v550_v14 }
 0x131   : > { %v608_v20 = vpop.f32.mrf.mxu1 }
 0x132   : > { %v609_v21 = vadd.f32 %v1791_v19, %v608_v20 }
 0x134   : > { %v656_v22 = vmul.f32 %v609_v21, %v1684_v50 }
 0x136   : > { %v672_v23 = vmul.f32 0.01, %v656_v22 }
 0x138   : > { %v688_v24 = vmax.f32 %v656_v22, %v672_v23 }
 0x139   : > { %v611_v25 = vpop.f32.mrf.mxu1 }
 0x13a   : > { %v612_v26 = vadd.f32 %v1791_v19, %v611_v25  ;;  %704 = vst [vmem:[%s1799_s23] sm:$0xff] %v688_v24  ;;  %756 = vmatmul.f32.vlgmr.msra.gmra.mxu2 %v688_v24 }
 0x13c   : > { %v657_v27 = vmul.f32 %v612_v26, %v1684_v50 }
 0x13d   : > { %v644_v28 = vpop.f32.mrf.mxu3 }
 0x13e   : > { %v645_v29 = vadd.f32 %v1791_v19, %v644_v28  ;;  %v673_v30 = vmul.f32 0.01, %v657_v27 }
 0x140   : > { %v668_v31 = vmul.f32 %v645_v29, %v1684_v50  ;;  %v689_v32 = vmax.f32 %v657_v27, %v673_v30 }
 0x141   : > { %v614_v33 = vpop.f32.mrf.mxu1 }
 0x142   : > { %v615_v34 = vadd.f32 %v1791_v19, %v614_v33  ;;  %v684_v35 = vmul.f32 0.01, %v668_v31  ;;  %705 = vst [vmem:[%s1799_s23 + $0x8] sm:$0xff] %v689_v32  ;;  %759 = vmatmul.f32.gmra.mxu2 %v689_v32 }
 0x144   : > { %v658_v36 = vmul.f32 %v615_v34, %v1684_v50  ;;  %v700_v37 = vmax.f32 %v668_v31, %v684_v35 }
 0x145   : > { %v647_v46 = vpop.f32.mrf.mxu3 }
 0x146   : > { %716 = vst [vmem:[%s1799_s23 + $0x60] sm:$0xff] %v700_v37  ;;  %v674_v38 = vmul.f32 0.01, %v658_v36  ;;  %792 = vmatmul.f32.vlgmr.msra.gmra.mxu3 %v700_v37  ;;  %v648_v49 = vadd.f32 %v1791_v19, %v647_v46 }
 0x148   : > { %v690_v39 = vmax.f32 %v658_v36, %v674_v38  ;;  %v669_v52 = vmul.f32 %v648_v49, %v1684_v50  ;;  %v1396_v38 = vld [vmem:[%s1997_s7] ss:$0 sm:$0xff] }
 0x149   : > { %v617_v40 = vpop.f32.mrf.mxu1 }
 0x14a   : > { %v618_v41 = vadd.f32 %v1791_v19, %v617_v40  ;;  %706 = vst [vmem:[%s1799_s23 + $0x10] sm:$0xff] %v690_v39  ;;  %762 = vmatmul.f32.gmra.mxu2 %v690_v39  ;;  %v685_v54 = vmul.f32 0.01, %v669_v52 }
 0x14c   : > { %v659_v42 = vmul.f32 %v618_v41, %v1684_v50  ;;  %v701_v56 = vmax.f32 %v669_v52, %v685_v54 }
 0x14d   : > { %v650_v58 = vpop.f32.mrf.mxu3 }
 0x14e   : > { %v675_v43 = vmul.f32 0.01, %v659_v42  ;;  %v651_v60 = vadd.f32 %v1791_v19, %v650_v58  ;;  %795 = vmatmul.f32.gmra.mxu3 %v701_v56  ;;  %717 = vst [vmem:[%s1799_s23 + $0x68] sm:$0xff] %v701_v56 }
 0x150   : > { %v691_v44 = vmax.f32 %v659_v42, %v675_v43  ;;  %v670_v62 = vmul.f32 %v651_v60, %v1684_v50 }
 0x151   : > { %v620_v45 = vpop.f32.mrf.mxu1 }
 0x152   : > { %v621_v47 = vadd.f32 %v1791_v19, %v620_v45  ;;  %707 = vst [vmem:[%s1799_s23 + $0x18] sm:$0xff] %v691_v44  ;;  %765 = vmatmul.f32.gmra.mxu2 %v691_v44  ;;  %v686_v0 = vmul.f32 0.01, %v670_v62 }
 0x154   : > { %v660_v51 = vmul.f32 %v621_v47, %v1684_v50  ;;  %v702_v2 = vmax.f32 %v670_v62, %v686_v0 }
 0x155   : > { %v653_v4 = vpop.f32.mrf.mxu3 }
 0x156   : > { %v676_v53 = vmul.f32 0.01, %v660_v51  ;;  %v654_v6 = vadd.f32 %v1791_v19, %v653_v4  ;;  %798 = vmatmul.f32.gmra.mxu3 %v702_v2  ;;  %718 = vst [vmem:[%s1799_s23 + $0x70] sm:$0xff] %v702_v2 }
 0x158   : > { %v692_v55 = vmax.f32 %v660_v51, %v676_v53  ;;  %v671_v8 = vmul.f32 %v654_v6, %v1684_v50 }
 0x159   : > { %v623_v57 = vpop.f32.mrf.mxu1 }
 0x15a   : > { %v624_v59 = vadd.f32 %v1791_v19, %v623_v57  ;;  %708 = vst [vmem:[%s1799_s23 + $0x20] sm:$0xff] %v692_v55  ;;  %768 = vmatmul.f32.gmra.mxu2 %v692_v55  ;;  %v687_v10 = vmul.f32 0.01, %v671_v8 }
 0x15c   : > { %v661_v61 = vmul.f32 %v624_v59, %v1684_v50  ;;  %v703_v12 = vmax.f32 %v671_v8, %v687_v10 }
 0x15e   : > { %v677_v63 = vmul.f32 0.01, %v661_v61  ;;  %801 = vmatmul.f32.gmra.mxu3 %v703_v12  ;;  %719 = vst [vmem:[%s1799_s23 + $0x78] sm:$0xff] %v703_v12 }
 0x160   : > { %v693_v1 = vmax.f32 %v661_v61, %v677_v63 }
 0x161   : > { %v626_v3 = vpop.f32.mrf.mxu1 }
 0x162   : > { %v627_v5 = vadd.f32 %v1791_v19, %v626_v3  ;;  %709 = vst [vmem:[%s1799_s23 + $0x28] sm:$0xff] %v693_v1  ;;  %771 = vmatmul.f32.gmra.mxu2 %v693_v1 }
 0x164   : > { %v662_v7 = vmul.f32 %v627_v5, %v1684_v50 }
 0x166   : > { %v678_v9 = vmul.f32 0.01, %v662_v7 }
 0x168   : > { %v694_v11 = vmax.f32 %v662_v7, %v678_v9 }
 0x169   : > { %v629_v13 = vpop.f32.mrf.mxu1 }
 0x16a   : > { %v630_v14 = vadd.f32 %v1791_v19, %v629_v13  ;;  %710 = vst [vmem:[%s1799_s23 + $0x30] sm:$0xff] %v694_v11  ;;  %774 = vmatmul.f32.gmra.mxu2 %v694_v11 }
 0x16c   : > { %v663_v15 = vmul.f32 %v630_v14, %v1684_v50 }
 0x16e   : > { %v679_v16 = vmul.f32 0.01, %v663_v15 }
 0x170   : > { %v695_v48 = vmax.f32 %v663_v15, %v679_v16 }
 0x171   : > { %v632_v17 = vpop.f32.mrf.mxu1 }
 0x172   : > { %v633_v18 = vadd.f32 %v1791_v19, %v632_v17  ;;  %711 = vst [vmem:[%s1799_s23 + $0x38] sm:$0xff] %v695_v48  ;;  %777 = vmatmul.f32.gmra.mxu2 %v695_v48 }
 0x174   : > { %v664_v20 = vmul.f32 %v633_v18, %v1684_v50 }
 0x176   : > { %v680_v21 = vmul.f32 0.01, %v664_v20 }
 0x178   : > { %v696_v22 = vmax.f32 %v664_v20, %v680_v21 }
 0x179   : > { %v635_v23 = vpop.f32.mrf.mxu1 }
 0x17a   : > { %v636_v24 = vadd.f32 %v1791_v19, %v635_v23  ;;  %712 = vst [vmem:[%s1799_s23 + $0x40] sm:$0xff] %v696_v22  ;;  %780 = vmatmul.f32.gmra.mxu2 %v696_v22 }
 0x17c   : > { %v665_v25 = vmul.f32 %v636_v24, %v1684_v50 }
 0x17e   : > { %v681_v26 = vmul.f32 0.01, %v665_v25 }
 0x180   : > { %v697_v27 = vmax.f32 %v665_v25, %v681_v26 }
 0x181   : > { %v638_v28 = vpop.f32.mrf.mxu1 }
 0x182   : > { %v639_v29 = vadd.f32 %v1791_v19, %v638_v28  ;;  %713 = vst [vmem:[%s1799_s23 + $0x48] sm:$0xff] %v697_v27  ;;  %783 = vmatmul.f32.gmra.mxu2 %v697_v27 }
 0x184   : > { %v666_v30 = vmul.f32 %v639_v29, %v1684_v50 }
 0x186   : > { %v682_v31 = vmul.f32 0.01, %v666_v30 }
 0x188   : > { %v698_v32 = vmax.f32 %v666_v30, %v682_v31 }
 0x189   : > { %v641_v33 = vpop.f32.mrf.mxu1 }
 0x18a   : > { %v642_v34 = vadd.f32 %v1791_v19, %v641_v33  ;;  %714 = vst [vmem:[%s1799_s23 + $0x50] sm:$0xff] %v698_v32  ;;  %786 = vmatmul.f32.gmra.mxu2 %v698_v32 }
 0x18c   : > { %v667_v35 = vmul.f32 %v642_v34, %v1684_v50 }
 0x18e   : > { %v683_v36 = vmul.f32 0.01, %v667_v35 }
 0x190   : > { %v699_v37 = vmax.f32 %v667_v35, %v683_v36 }
 0x192   : > { %715 = vst [vmem:[%s1799_s23 + $0x58] sm:$0xff] %v699_v37  ;;  %789 = vmatmul.f32.gmra.mxu2 %v699_v37 }
 0x1bd   : > { %v757_v39 = vpop.f32.mrf.mxu2 }
 0x1be   : > { %v758_v40 = vadd.f32 %v1396_v38, %v757_v39 }
 0x1c0   : > { %805 = vmax.xlane.f32.xlu0 %v758_v40 }
 0x1c5   : > { %v760_v41 = vpop.f32.mrf.mxu2 }
 0x1c6   : > { %v761_v42 = vadd.f32 %v1396_v38, %v760_v41 }
 0x1c8   : > { %807 = vmax.xlane.f32.xlu0 %v761_v42 }
 0x1c9   : > { %v793_v43 = vpop.f32.mrf.mxu3 }
 0x1ca   : > { %v794_v19 = vadd.f32 %v1396_v38, %v793_v43 }
 0x1cd   : > { %v763_v44 = vpop.f32.mrf.mxu2 }
 0x1ce   : > { %v764_v45 = vadd.f32 %v1396_v38, %v763_v44 }
 0x1d0   : > { %809 = vmax.xlane.f32.xlu1 %v764_v45  ;;  %829 = vmax.xlane.f32.xlu0 %v794_v19 }
 0x1d1   : > { %v796_v56 = vpop.f32.mrf.mxu3 }
 0x1d2   : > { %v1874_v4 = vadd.f32 %v1396_v38, %v796_v56 }
 0x1d5   : > { %v766_v50 = vpop.f32.mrf.mxu2 }
 0x1d6   : > { %v767_v46 = vadd.f32 %v1396_v38, %v766_v50 }
 0x1d8   : > { %811 = vmax.xlane.f32.xlu1 %v767_v46 }
 0x1d9   : > { %v799_v60 = vpop.f32.mrf.mxu3 }
 0x1da   : > { %v1880_v6 = vadd.f32 %v1396_v38, %v799_v60 }
 0x1dd   : > { %v769_v47 = vpop.f32.mrf.mxu2 }
 0x1de   : > { %v1850_v49 = vadd.f32 %v1396_v38, %v769_v47 }
 0x1e0   : > { %813 = vmax.xlane.f32.xlu2 %v1850_v49 }
 0x1e1   : > { %v802_v63 = vpop.f32.mrf.mxu3 }
 0x1e2   : > { %v1868_v0 = vadd.f32 %v1396_v38, %v802_v63 }
 0x1e5   : > { %v772_v51 = vpop.f32.mrf.mxu2 }
 0x1e6   : > { %v1853_v52 = vadd.f32 %v1396_v38, %v772_v51 }
 0x1e8   : > { %815 = vmax.xlane.f32.xlu2 %v1853_v52 }
 0x1ed   : > { %v775_v53 = vpop.f32.mrf.mxu2 }
 0x1ee   : > { %v1856_v54 = vadd.f32 %v1396_v38, %v775_v53 }
 0x1f0   : > { %817 = vmax.xlane.f32.xlu0 %v1856_v54 }
 0x1f5   : > { %v778_v55 = vpop.f32.mrf.mxu2 }
 0x1f6   : > { %v1859_v57 = vadd.f32 %v1396_v38, %v778_v55 }
 0x1f8   : > { %819 = vmax.xlane.f32.xlu1 %v1859_v57 }
 0x1fd   : > { %v781_v58 = vpop.f32.mrf.mxu2 }
 0x1fe   : > { %v1862_v59 = vadd.f32 %v1396_v38, %v781_v58 }
 0x200   : > { %821 = vmax.xlane.f32.xlu2 %v1862_v59 }
 0x205   : > { %v784_v61 = vpop.f32.mrf.mxu2 }
 0x206   : > { %v1865_v62 = vadd.f32 %v1396_v38, %v784_v61 }
 0x208   : > { %823 = vmax.xlane.f32.xlu0 %v1865_v62 }
 0x20d   : > { %v787_v1 = vpop.f32.mrf.mxu2 }
 0x20e   : > { %v1870_v2 = vadd.f32 %v1396_v38, %v787_v1 }
 0x210   : > { %825 = vmax.xlane.f32.xlu1 %v1870_v2  ;;  %835 = vmax.xlane.f32.xlu0 %v1868_v0 }
 0x215   : > { %v790_v3 = vpop.f32.mrf.mxu2 }
 0x216   : > { %v1876_v5 = vadd.f32 %v1396_v38, %v790_v3 }
 0x218   : > { %827 = vmax.xlane.f32.xlu2 %v1876_v5  ;;  %831 = vmax.xlane.f32.xlu1 %v1874_v4 }
 0x220   : > { %833 = vmax.xlane.f32.xlu2 %v1880_v6 }
 0x233   : > { %v806_v7 = vpop.xlane.xlu0 %805 }
 0x234   : > { %v837_v8 = vsub.f32 %v758_v40, %v806_v7 }
 0x236   : > { %v853_v9 = vmul.f32 1.442695, %v837_v8 }
 0x238   : > { %1397 = vpow2.f32 %v853_v9 }
 0x23b   : > { %v808_v10 = vpop.xlane.xlu0 %807 }
 0x23c   : > { %v838_v11 = vsub.f32 %v761_v42, %v808_v10 }
 0x23e   : > { %v1883_v12 = vpop.eup %1397  ;;  %v855_v13 = vmul.f32 1.442695, %v838_v11 }
 0x23f   : > { %885 = vadd.xlane.f32.xlu1 %v1883_v12 }
 0x240   : > { %1399 = vpow2.f32 %v855_v13 }
 0x243   : > { %v810_v14 = vpop.xlane.xlu1 %809  ;;  %v830_v15 = vpop.xlane.xlu0 %829 }
 0x244   : > { %v839_v16 = vsub.f32 %v764_v45, %v810_v14  ;;  %v849_v48 = vsub.f32 %v794_v19, %v830_v15 }
 0x246   : > { %v1886_v17 = vpop.eup %1399  ;;  %v857_v18 = vmul.f32 1.442695, %v839_v16  ;;  %v877_v20 = vmul.f32 1.442695, %v849_v48 }
 0x247   : > { %887 = vadd.xlane.f32.xlu2 %v1886_v17 }
 0x248   : > { %1401 = vpow2.f32 %v857_v18 }
 0x249   : > { %1403 = vpow2.f32 %v877_v20 }
 0x24b   : > { %v812_v21 = vpop.xlane.xlu1 %811 }
 0x24c   : > { %v840_v22 = vsub.f32 %v767_v46, %v812_v21 }
 0x24e   : > { %v1889_v23 = vpop.eup %1401  ;;  %v859_v24 = vmul.f32 1.442695, %v840_v22 }
 0x24f   : > { %v1891_v25 = vpop.eup %1403  ;;  %889 = vadd.xlane.f32.xlu0 %v1889_v23 }
 0x250   : > { %1405 = vpow2.f32 %v859_v24  ;;  %909 = vadd.xlane.f32.xlu1 %v1891_v25 }
 0x253   : > { %v814_v26 = vpop.xlane.xlu2 %813 }
 0x254   : > { %v841_v27 = vsub.f32 %v1850_v49, %v814_v26 }
 0x256   : > { %v1896_v28 = vpop.eup %1405  ;;  %v861_v29 = vmul.f32 1.442695, %v841_v27 }
 0x258   : > { %1407 = vpow2.f32 %v861_v29  ;;  %891 = vadd.xlane.f32.xlu1 %v1896_v28 }
 0x25b   : > { %v816_v30 = vpop.xlane.xlu2 %815 }
 0x25c   : > { %v842_v31 = vsub.f32 %v1853_v52, %v816_v30 }
 0x25e   : > { %v1900_v32 = vpop.eup %1407  ;;  %v863_v33 = vmul.f32 1.442695, %v842_v31 }
 0x25f   : > { %893 = vadd.xlane.f32.xlu2 %v1900_v32 }
 0x260   : > { %1409 = vpow2.f32 %v863_v33 }
 0x263   : > { %v818_v34 = vpop.xlane.xlu0 %817 }
 0x264   : > { %v843_v35 = vsub.f32 %v1856_v54, %v818_v34 }
 0x266   : > { %v1904_v36 = vpop.eup %1409  ;;  %v865_v37 = vmul.f32 1.442695, %v843_v35 }
 0x267   : > { %895 = vadd.xlane.f32.xlu0 %v1904_v36 }
 0x268   : > { %1411 = vpow2.f32 %v865_v37 }
 0x26b   : > { %v820_v38 = vpop.xlane.xlu1 %819 }
 0x26c   : > { %v844_v39 = vsub.f32 %v1859_v57, %v820_v38 }
 0x26e   : > { %v1908_v40 = vpop.eup %1411  ;;  %v867_v41 = vmul.f32 1.442695, %v844_v39 }
 0x26f   : > { %897 = vadd.xlane.f32.xlu1 %v1908_v40 }
 0x270   : > { %1413 = vpow2.f32 %v867_v41 }
 0x273   : > { %v822_v42 = vpop.xlane.xlu2 %821 }
 0x274   : > { %v845_v43 = vsub.f32 %v1862_v59, %v822_v42 }
 0x276   : > { %v1912_v19 = vpop.eup %1413  ;;  %v869_v44 = vmul.f32 1.442695, %v845_v43 }
 0x277   : > { %899 = vadd.xlane.f32.xlu2 %v1912_v19 }
 0x278   : > { %1415 = vpow2.f32 %v869_v44 }
 0x27b   : > { %v824_v45 = vpop.xlane.xlu0 %823 }
 0x27c   : > { %v846_v50 = vsub.f32 %v1865_v62, %v824_v45 }
 0x27e   : > { %v1916_v46 = vpop.eup %1415  ;;  %v871_v47 = vmul.f32 1.442695, %v846_v50 }
 0x27f   : > { %901 = vadd.xlane.f32.xlu0 %v1916_v46 }
 0x280   : > { %1417 = vpow2.f32 %v871_v47 }
 0x283   : > { %v826_v49 = vpop.xlane.xlu1 %825  ;;  %v836_v51 = vpop.xlane.xlu0 %835 }
 0x284   : > { %v847_v52 = vsub.f32 %v1870_v2, %v826_v49  ;;  %v852_v53 = vsub.f32 %v1868_v0, %v836_v51 }
 0x286   : > { %v1921_v54 = vpop.eup %1417  ;;  %v873_v55 = vmul.f32 1.442695, %v847_v52  ;;  %v883_v56 = vmul.f32 1.442695, %v852_v53 }
 0x287   : > { %903 = vadd.xlane.f32.xlu1 %v1921_v54 }
 0x288   : > { %1419 = vpow2.f32 %v873_v55 }
 0x289   : > { %1421 = vpow2.f32 %v883_v56 }
 0x28b   : > { %v828_v57 = vpop.xlane.xlu2 %827  ;;  %v832_v58 = vpop.xlane.xlu1 %831 }
 0x28c   : > { %v848_v59 = vsub.f32 %v1876_v5, %v828_v57  ;;  %v850_v60 = vsub.f32 %v1874_v4, %v832_v58 }
 0x28e   : > { %v1926_v61 = vpop.eup %1419  ;;  %v875_v62 = vmul.f32 1.442695, %v848_v59  ;;  %v879_v63 = vmul.f32 1.442695, %v850_v60 }
 0x28f   : > { %v1928_v1 = vpop.eup %1421  ;;  %905 = vadd.xlane.f32.xlu2 %v1926_v61 }
 0x290   : > { %1423 = vpow2.f32 %v875_v62  ;;  %915 = vadd.xlane.f32.xlu1 %v1928_v1 }
 0x291   : > { %1425 = vpow2.f32 %v879_v63 }
 0x293   : > { %v834_v0 = vpop.xlane.xlu2 %833 }
 0x294   : > { %v851_v2 = vsub.f32 %v1880_v6, %v834_v0 }
 0x296   : > { %v1933_v3 = vpop.eup %1423  ;;  %v881_v5 = vmul.f32 1.442695, %v851_v2 }
 0x297   : > { %v1935_v7 = vpop.eup %1425  ;;  %907 = vadd.xlane.f32.xlu0 %v1933_v3 }
 0x298   : > { %1427 = vpow2.f32 %v881_v5  ;;  %911 = vadd.xlane.f32.xlu2 %v1935_v7 }
 0x29e   : > { %v1939_v4 = vpop.eup %1427 }
 0x29f   : > { %913 = vadd.xlane.f32.xlu0 %v1939_v4 }
 0x2b2   : > { %v886_v8 = vpop.xlane.xlu1 %885 }
 0x2b3   : > { %1429 = vrcp.f32 %v886_v8  ;;  %v928_v13 = vand.u32 2147483648, %v886_v8  ;;  %v926_v15 = vand.u32 2147483647, %v886_v8  ;;  %vm922_vm1 = vweird.f32 %v886_v8 }
 0x2b5   : > { %v929_v18 = vor.u32 1.1754944e-38, %v928_v13  ;;  %vm927_vm3 = vcmp.eq.f32.partialorder %v926_v15, 8.507059e+37 }
 0x2b9   : > { %v1430_v9 = vpop.eup %1429 }
 0x2ba   : > { %v918_v10 = vmul.f32 %v1430_v9, %v886_v8  ;;  %v888_v11 = vpop.xlane.xlu2 %887  ;;  %vm923_vm0 = vweird.f32 %v1430_v9 }
 0x2bb   : > { %1431 = vrcp.f32 %v888_v11  ;;  %vm924_vm2 = vmor %vm922_vm1, %vm923_vm0  ;;  %v943_v30 = vand.u32 2147483648, %v888_v11  ;;  %v941_v33 = vand.u32 2147483647, %v888_v11  ;;  %vm937_vm5 = vweird.f32 %v888_v11 }
 0x2bc   : > { %v919_v6 = vsub.f32 1.0, %v918_v10 }
 0x2bd   : > { %v944_v37 = vor.u32 1.1754944e-38, %v943_v30  ;;  %vm942_vm7 = vcmp.eq.f32.partialorder %v941_v33, 8.507059e+37 }
 0x2be   : > { %v920_v14 = vmul.f32 %v1430_v9, %v919_v6 }
 0x2c0   : > { %v921_v16 = vadd.f32 %v1430_v9, %v920_v14 }
 0x2c1   : > { %v1432_v48 = vpop.eup %1431 }
 0x2c2   : > { %v925_v20 = vsel %vm924_vm2, %v1430_v9, %v921_v16  ;;  %v933_v21 = vmul.f32 %v1432_v48, %v888_v11  ;;  %v890_v22 = vpop.xlane.xlu0 %889  ;;  %vm938_vm4 = vweird.f32 %v1432_v48 }
 0x2c3   : > { %v930_v24 = vsel %vm927_vm3, %v929_v18, %v925_v20  ;;  %v910_v26 = vpop.xlane.xlu1 %909  ;;  %1433 = vrcp.f32 %v890_v22  ;;  %vm939_vm6 = vmor %vm937_vm5, %vm938_vm4  ;;  %v958_v47 = vand.u32 2147483648, %v890_v22  ;;  %v956_v52 = vand.u32 2147483647, %v890_v22 }
 0x2c4   : > { %v931_v27 = vmul.f32 %v1883_v12, %v930_v24  ;;  %v934_v29 = vsub.f32 1.0, %v933_v21  ;;  %1435 = vrcp.f32 %v910_v26  ;;  %v1108_v49 = vand.u32 2147483648, %v910_v26 }
 0x2c5   : > { %v1106_v55 = vand.u32 2147483647, %v910_v26  ;;  %vm952_vm10 = vweird.f32 %v890_v22  ;;  %vm1102_vm11 = vweird.f32 %v910_v26  ;;  %v959_v58 = vor.u32 1.1754944e-38, %v958_v47 }
 0x2c6   : > { %1157 = vst [vmem:[%s1946_s28] sm:$0xff] %v931_v27  ;;  %v935_v31 = vmul.f32 %v1432_v48, %v934_v29  ;;  %v1109_v59 = vor.u32 1.1754944e-38, %v1108_v49  ;;  %vm957_vm14 = vcmp.eq.f32.partialorder %v956_v52, 8.507059e+37 }
 0x2c7   : > { %vm1107_vm15 = vcmp.eq.f32.partialorder %v1106_v55, 8.507059e+37 }
 0x2c8   : > { %v936_v34 = vadd.f32 %v1432_v48, %v935_v31 }
 0x2c9   : > { %v1434_v35 = vpop.eup %1433 }
 0x2ca   : > { %v1436_v38 = vpop.eup %1435  ;;  %v940_v39 = vsel %vm939_vm6, %v1432_v48, %v936_v34  ;;  %v948_v41 = vmul.f32 %v1434_v35, %v890_v22  ;;  %vm953_vm8 = vweird.f32 %v1434_v35 }
 0x2cb   : > { %v945_v42 = vsel %vm942_vm7, %v944_v37, %v940_v39  ;;  %v1098_v43 = vmul.f32 %v1436_v38, %v910_v26  ;;  %v892_v12 = vpop.xlane.xlu1 %891  ;;  %vm1103_vm9 = vweird.f32 %v1436_v38  ;;  %vm954_vm12 = vmor %vm952_vm10, %vm953_vm8 }
 0x2cc   : > { %v946_v44 = vmul.f32 %v1886_v17, %v945_v42  ;;  %v949_v45 = vsub.f32 1.0, %v948_v41  ;;  %1437 = vrcp.f32 %v892_v12  ;;  %vm1104_vm13 = vmor %vm1102_vm11, %vm1103_vm9  ;;  %v973_v11 = vand.u32 2147483648, %v892_v12 }
 0x2cd   : > { %v1099_v50 = vsub.f32 1.0, %v1098_v43  ;;  %v971_v13 = vand.u32 2147483647, %v892_v12  ;;  %vm967_vm1 = vweird.f32 %v892_v12 }
 0x2ce   : > { %1158 = vst [vmem:[%s1946_s28 + $0x8] sm:$0xff] %v946_v44  ;;  %v950_v51 = vmul.f32 %v1434_v35, %v949_v45  ;;  %v974_v16 = vor.u32 1.1754944e-38, %v973_v11 }
 0x2cf   : > { %v1100_v53 = vmul.f32 %v1436_v38, %v1099_v50  ;;  %vm972_vm3 = vcmp.eq.f32.partialorder %v971_v13, 8.507059e+37 }
 0x2d0   : > { %v951_v56 = vadd.f32 %v1434_v35, %v950_v51 }
 0x2d1   : > { %v1101_v57 = vadd.f32 %v1436_v38, %v1100_v53 }
 0x2d2   : > { %v1438_v17 = vpop.eup %1437  ;;  %v955_v60 = vsel %vm954_vm12, %v1434_v35, %v951_v56  ;;  %v894_v62 = vpop.xlane.xlu2 %893 }
 0x2d3   : > { %v1105_v63 = vsel %vm1104_vm13, %v1436_v38, %v1101_v57  ;;  %v960_v0 = vsel %vm957_vm14, %v959_v58, %v955_v60  ;;  %v963_v2 = vmul.f32 %v1438_v17, %v892_v12  ;;  %1439 = vrcp.f32 %v894_v62 }
 0x2d4   : > { %v1110_v5 = vsel %vm1107_vm15, %v1109_v59, %v1105_v63  ;;  %v961_v8 = vmul.f32 %v1889_v23, %v960_v0  ;;  %vm968_vm0 = vweird.f32 %v1438_v17  ;;  %v988_v22 = vand.u32 2147483648, %v894_v62 }
 0x2d5   : > { %v1111_v9 = vmul.f32 %v1891_v25, %v1110_v5  ;;  %v964_v10 = vsub.f32 1.0, %v963_v2  ;;  %vm969_vm2 = vmor %vm967_vm1, %vm968_vm0  ;;  %v986_v26 = vand.u32 2147483647, %v894_v62  ;;  %vm982_vm5 = vweird.f32 %v894_v62 }
 0x2d6   : > { %1159 = vst [vmem:[%s1946_s28 + $0x10] sm:$0xff] %v961_v8  ;;  %v989_v30 = vor.u32 1.1754944e-38, %v988_v22 }
 0x2d7   : > { %1169 = vst [vmem:[%s1946_s28 + $0x60] sm:$0xff] %v1111_v9  ;;  %v965_v6 = vmul.f32 %v1438_v17, %v964_v10  ;;  %vm987_vm7 = vcmp.eq.f32.partialorder %v986_v26, 8.507059e+37 }
 0x2d9   : > { %v966_v14 = vadd.f32 %v1438_v17, %v965_v6  ;;  %v1440_v15 = vpop.eup %1439 }
 0x2da   : > { %v896_v48 = vpop.xlane.xlu0 %895  ;;  %v978_v23 = vmul.f32 %v1440_v15, %v894_v62  ;;  %vm983_vm4 = vweird.f32 %v1440_v15 }
 0x2db   : > { %v970_v18 = vsel %vm969_vm2, %v1438_v17, %v966_v14  ;;  %1441 = vrcp.f32 %v896_v48  ;;  %vm984_vm6 = vmor %vm982_vm5, %vm983_vm4  ;;  %v1003_v38 = vand.u32 2147483648, %v896_v48  ;;  %v1001_v41 = vand.u32 2147483647, %v896_v48 }
 0x2dc   : > { %v975_v20 = vsel %vm972_vm3, %v974_v16, %v970_v18  ;;  %v979_v21 = vsub.f32 1.0, %v978_v23  ;;  %vm997_vm9 = vweird.f32 %v896_v48 }
 0x2dd   : > { %v976_v25 = vmul.f32 %v1896_v28, %v975_v20  ;;  %v1004_v12 = vor.u32 1.1754944e-38, %v1003_v38  ;;  %vm1002_vm11 = vcmp.eq.f32.partialorder %v1001_v41, 8.507059e+37 }
 0x2de   : > { %v980_v24 = vmul.f32 %v1440_v15, %v979_v21 }
 0x2df   : > { %1160 = vst [vmem:[%s1946_s28 + $0x18] sm:$0xff] %v976_v25 }
 0x2e0   : > { %v981_v29 = vadd.f32 %v1440_v15, %v980_v24 }
 0x2e1   : > { %v1442_v27 = vpop.eup %1441 }
 0x2e2   : > { %v993_v31 = vmul.f32 %v1442_v27, %v896_v48  ;;  %v898_v33 = vpop.xlane.xlu1 %897  ;;  %v985_v34 = vsel %vm984_vm6, %v1440_v15, %v981_v29  ;;  %vm998_vm8 = vweird.f32 %v1442_v27 }
 0x2e3   : > { %1443 = vrcp.f32 %v898_v33  ;;  %v990_v35 = vsel %vm987_vm7, %v989_v30, %v985_v34  ;;  %vm999_vm10 = vmor %vm997_vm9, %vm998_vm8  ;;  %v1018_v51 = vand.u32 2147483648, %v898_v33  ;;  %v1016_v53 = vand.u32 2147483647, %v898_v33 }
 0x2e4   : > { %v994_v37 = vsub.f32 1.0, %v993_v31  ;;  %v991_v28 = vmul.f32 %v1900_v32, %v990_v35  ;;  %vm1012_vm13 = vweird.f32 %v898_v33 }
 0x2e5   : > { %v1019_v57 = vor.u32 1.1754944e-38, %v1018_v51  ;;  %vm1017_vm15 = vcmp.eq.f32.partialorder %v1016_v53, 8.507059e+37 }
 0x2e6   : > { %v995_v39 = vmul.f32 %v1442_v27, %v994_v37  ;;  %1161 = vst [vmem:[%s1946_s28 + $0x20] sm:$0xff] %v991_v28 }
 0x2e8   : > { %v996_v42 = vadd.f32 %v1442_v27, %v995_v39 }
 0x2e9   : > { %v1444_v43 = vpop.eup %1443 }
 0x2ea   : > { %v1000_v44 = vsel %vm999_vm10, %v1442_v27, %v996_v42  ;;  %v1008_v45 = vmul.f32 %v1444_v43, %v898_v33  ;;  %v900_v50 = vpop.xlane.xlu2 %899  ;;  %vm1013_vm12 = vweird.f32 %v1444_v43 }
 0x2eb   : > { %v1005_v47 = vsel %vm1002_vm11, %v1004_v12, %v1000_v44  ;;  %1445 = vrcp.f32 %v900_v50  ;;  %vm1014_vm14 = vmor %vm1012_vm13, %vm1013_vm12  ;;  %v1033_v63 = vand.u32 2147483648, %v900_v50  ;;  %v1031_v2 = vand.u32 2147483647, %v900_v50 }
 0x2ec   : > { %v1006_v49 = vmul.f32 %v1904_v36, %v1005_v47  ;;  %v1009_v32 = vsub.f32 1.0, %v1008_v45  ;;  %vm1027_vm1 = vweird.f32 %v900_v50 }
 0x2ed   : > { %v1034_v9 = vor.u32 1.1754944e-38, %v1033_v63  ;;  %vm1032_vm3 = vcmp.eq.f32.partialorder %v1031_v2, 8.507059e+37 }
 0x2ee   : > { %1162 = vst [vmem:[%s1946_s28 + $0x28] sm:$0xff] %v1006_v49  ;;  %v1010_v52 = vmul.f32 %v1444_v43, %v1009_v32 }
 0x2f0   : > { %v1011_v55 = vadd.f32 %v1444_v43, %v1010_v52 }
 0x2f1   : > { %v1446_v56 = vpop.eup %1445 }
 0x2f2   : > { %v1015_v58 = vsel %vm1014_vm14, %v1444_v43, %v1011_v55  ;;  %v1023_v17 = vmul.f32 %v1446_v56, %v900_v50  ;;  %v902_v59 = vpop.xlane.xlu0 %901  ;;  %vm1028_vm0 = vweird.f32 %v1446_v56 }
 0x2f3   : > { %v1020_v60 = vsel %vm1017_vm15, %v1019_v57, %v1015_v58  ;;  %1447 = vrcp.f32 %v902_v59  ;;  %vm1029_vm2 = vmor %vm1027_vm1, %vm1028_vm0  ;;  %v1048_v15 = vand.u32 2147483648, %v902_v59  ;;  %v1046_v48 = vand.u32 2147483647, %v902_v59 }
 0x2f4   : > { %v1021_v36 = vmul.f32 %v1908_v40, %v1020_v60  ;;  %v1024_v62 = vsub.f32 1.0, %v1023_v17  ;;  %vm1042_vm5 = vweird.f32 %v902_v59 }
 0x2f5   : > { %v1049_v20 = vor.u32 1.1754944e-38, %v1048_v15  ;;  %vm1047_vm7 = vcmp.eq.f32.partialorder %v1046_v48, 8.507059e+37 }
 0x2f6   : > { %1163 = vst [vmem:[%s1946_s28 + $0x30] sm:$0xff] %v1021_v36  ;;  %v1025_v0 = vmul.f32 %v1446_v56, %v1024_v62 }
 0x2f8   : > { %v1026_v5 = vadd.f32 %v1446_v56, %v1025_v0 }
 0x2f9   : > { %v1448_v8 = vpop.eup %1447 }
 0x2fa   : > { %v1030_v10 = vsel %vm1029_vm2, %v1446_v56, %v1026_v5  ;;  %v1038_v11 = vmul.f32 %v1448_v8, %v902_v59  ;;  %v904_v6 = vpop.xlane.xlu1 %903  ;;  %vm1043_vm4 = vweird.f32 %v1448_v8 }
 0x2fb   : > { %v1035_v13 = vsel %vm1032_vm3, %v1034_v9, %v1030_v10  ;;  %1449 = vrcp.f32 %v904_v6  ;;  %vm1044_vm6 = vmor %vm1042_vm5, %vm1043_vm4  ;;  %v1063_v29 = vand.u32 2147483648, %v904_v6  ;;  %v1061_v31 = vand.u32 2147483647, %v904_v6 }
 0x2fc   : > { %v1036_v40 = vmul.f32 %v1912_v19, %v1035_v13  ;;  %v1039_v14 = vsub.f32 1.0, %v1038_v11  ;;  %vm1057_vm9 = vweird.f32 %v904_v6 }
 0x2fd   : > { %v1064_v35 = vor.u32 1.1754944e-38, %v1063_v29  ;;  %vm1062_vm11 = vcmp.eq.f32.partialorder %v1061_v31, 8.507059e+37 }
 0x2fe   : > { %1164 = vst [vmem:[%s1946_s28 + $0x38] sm:$0xff] %v1036_v40  ;;  %v1040_v16 = vmul.f32 %v1448_v8, %v1039_v14 }
 0x300   : > { %v1041_v18 = vadd.f32 %v1448_v8, %v1040_v16 }
 0x301   : > { %v1450_v23 = vpop.eup %1449 }
 0x302   : > { %v1045_v25 = vsel %vm1044_vm6, %v1448_v8, %v1041_v18  ;;  %v1053_v21 = vmul.f32 %v1450_v23, %v904_v6  ;;  %v906_v22 = vpop.xlane.xlu2 %905  ;;  %vm1058_vm8 = vweird.f32 %v1450_v23 }
 0x303   : > { %v1050_v24 = vsel %vm1047_vm7, %v1049_v20, %v1045_v25  ;;  %1451 = vrcp.f32 %v906_v22  ;;  %v916_v26 = vpop.xlane.xlu1 %915  ;;  %vm1059_vm10 = vmor %vm1057_vm9, %vm1058_vm8  ;;  %v1078_v44 = vand.u32 2147483648, %v906_v22  ;;  %v1076_v47 = vand.u32 2147483647, %v906_v22 }
 0x304   : > { %v1051_v19 = vmul.f32 %v1916_v46, %v1050_v24  ;;  %v1054_v27 = vsub.f32 1.0, %v1053_v21  ;;  %1453 = vrcp.f32 %v916_v26  ;;  %v1153_v49 = vand.u32 2147483648, %v916_v26 }
 0x305   : > { %v1151_v51 = vand.u32 2147483647, %v916_v26  ;;  %vm1072_vm14 = vweird.f32 %v906_v22  ;;  %v1079_v55 = vor.u32 1.1754944e-38, %v1078_v44  ;;  %vm1147_vm0 = vweird.f32 %v916_v26 }
 0x306   : > { %1165 = vst [vmem:[%s1946_s28 + $0x40] sm:$0xff] %v1051_v19  ;;  %v1055_v30 = vmul.f32 %v1450_v23, %v1054_v27  ;;  %vm1077_vm1 = vcmp.eq.f32.partialorder %v1076_v47, 8.507059e+37  ;;  %v1154_v58 = vor.u32 1.1754944e-38, %v1153_v49 }
 0x307   : > { %vm1152_vm3 = vcmp.eq.f32.partialorder %v1151_v51, 8.507059e+37 }
 0x308   : > { %v1056_v33 = vadd.f32 %v1450_v23, %v1055_v30 }
 0x309   : > { %v1452_v34 = vpop.eup %1451 }
 0x30a   : > { %v1454_v37 = vpop.eup %1453  ;;  %v1060_v28 = vsel %vm1059_vm10, %v1450_v23, %v1056_v33  ;;  %v1068_v38 = vmul.f32 %v1452_v34, %v906_v22  ;;  %v1968_v39 = vpop.xlane.xlu0 %907  ;;  %vm1073_vm12 = vweird.f32 %v1452_v34 }
 0x30b   : > { %v1065_v46 = vsel %vm1062_vm11, %v1064_v35, %v1060_v28  ;;  %v1143_v41 = vmul.f32 %v1454_v37, %v916_v26  ;;  %v912_v42 = vpop.xlane.xlu2 %911  ;;  %1455 = vrcp.f32 %v1968_v39  ;;  %vm1148_vm13 = vweird.f32 %v1454_v37  ;;  %vm1074_vm15 = vmor %vm1072_vm14, %vm1073_vm12 }
 0x30c   : > { %v1066_v43 = vmul.f32 %v1921_v54, %v1065_v46  ;;  %v1069_v12 = vsub.f32 1.0, %v1068_v38  ;;  %1457 = vrcp.f32 %v912_v42  ;;  %vm1149_vm2 = vmor %vm1147_vm0, %vm1148_vm13  ;;  %v1093_v9 = vand.u32 2147483648, %v1968_v39 }
 0x30d   : > { %v1144_v45 = vsub.f32 1.0, %v1143_v41  ;;  %v1123_v10 = vand.u32 2147483648, %v912_v42  ;;  %v1091_v6 = vand.u32 2147483647, %v1968_v39  ;;  %v1121_v40 = vand.u32 2147483647, %v912_v42 }
 0x30e   : > { %1166 = vst [vmem:[%s1946_s28 + $0x48] sm:$0xff] %v1066_v43  ;;  %v1070_v50 = vmul.f32 %v1452_v34, %v1069_v12  ;;  %vm1087_vm6 = vweird.f32 %v1968_v39  ;;  %vm1117_vm7 = vweird.f32 %v912_v42 }
 0x30f   : > { %v1145_v32 = vmul.f32 %v1454_v37, %v1144_v45  ;;  %v1124_v16 = vor.u32 1.1754944e-38, %v1123_v10  ;;  %vm1092_vm10 = vcmp.eq.f32.partialorder %v1091_v6, 8.507059e+37  ;;  %vm1122_vm11 = vcmp.eq.f32.partialorder %v1121_v40, 8.507059e+37 }
 0x310   : > { %v1071_v52 = vadd.f32 %v1452_v34, %v1070_v50 }
 0x311   : > { %v1456_v53 = vpop.eup %1455  ;;  %v1146_v56 = vadd.f32 %v1454_v37, %v1145_v32 }
 0x312   : > { %v1458_v54 = vpop.eup %1457  ;;  %v1075_v57 = vsel %vm1074_vm15, %v1452_v34, %v1071_v52  ;;  %v1083_v17 = vmul.f32 %v1456_v53, %v1968_v39  ;;  %v914_v59 = vpop.xlane.xlu0 %913  ;;  %vm1088_vm4 = vweird.f32 %v1456_v53 }
 0x313   : > { %v1080_v60 = vsel %vm1077_vm1, %v1079_v55, %v1075_v57  ;;  %v1150_v36 = vsel %vm1149_vm2, %v1454_v37, %v1146_v56  ;;  %v1113_v62 = vmul.f32 %v1458_v54, %v912_v42  ;;  %1459 = vrcp.f32 %v914_v59  ;;  %vm1089_vm8 = vmor %vm1087_vm6, %vm1088_vm4 }
 0x314   : > { %v1081_v63 = vmul.f32 %v1926_v61, %v1080_v60  ;;  %v1155_v0 = vsel %vm1152_vm3, %v1154_v58, %v1150_v36  ;;  %v1084_v2 = vsub.f32 1.0, %v1083_v17  ;;  %vm1118_vm5 = vweird.f32 %v1458_v54 }
 0x315   : > { %v1156_v5 = vmul.f32 %v1928_v1, %v1155_v0  ;;  %v1114_v8 = vsub.f32 1.0, %v1113_v62  ;;  %v1094_v1 = vor.u32 1.1754944e-38, %v1093_v9  ;;  %vm1119_vm9 = vmor %vm1117_vm7, %vm1118_vm5  ;;  %v1138_v26 = vand.u32 2147483648, %v914_v59 }
 0x316   : > { %1167 = vst [vmem:[%s1946_s28 + $0x50] sm:$0xff] %v1081_v63  ;;  %v1085_v11 = vmul.f32 %v1456_v53, %v1084_v2  ;;  %v1136_v27 = vand.u32 2147483647, %v914_v59  ;;  %vm1132_vm13 = vweird.f32 %v914_v59 }
 0x317   : > { %1172 = vst [vmem:[%s1946_s28 + $0x78] sm:$0xff] %v1156_v5  ;;  %v1115_v13 = vmul.f32 %v1458_v54, %v1114_v8  ;;  %v1139_v30 = vor.u32 1.1754944e-38, %v1138_v26 }
 0x318   : > { %v1086_v14 = vadd.f32 %v1456_v53, %v1085_v11  ;;  %vm1137_vm15 = vcmp.eq.f32.partialorder %v1136_v27, 8.507059e+37 }
 0x319   : > { %v1116_v61 = vadd.f32 %v1458_v54, %v1115_v13  ;;  %v1460_v15 = vpop.eup %1459 }
 0x31a   : > { %v1090_v48 = vsel %vm1089_vm8, %v1456_v53, %v1086_v14  ;;  %v1128_v20 = vmul.f32 %v1460_v15, %v914_v59  ;;  %vm1133_vm12 = vweird.f32 %v1460_v15 }
 0x31b   : > { %v1120_v18 = vsel %vm1119_vm9, %v1458_v54, %v1116_v61  ;;  %v1095_v23 = vsel %vm1092_vm10, %v1094_v1, %v1090_v48  ;;  %vm1134_vm14 = vmor %vm1132_vm13, %vm1133_vm12 }
 0x31c   : > { %v1125_v25 = vsel %vm1122_vm11, %v1124_v16, %v1120_v18  ;;  %v1096_v21 = vmul.f32 %v1933_v3, %v1095_v23  ;;  %v1129_v24 = vsub.f32 1.0, %v1128_v20 }
 0x31d   : > { %v1126_v22 = vmul.f32 %v1935_v7, %v1125_v25 }
 0x31e   : > { %1168 = vst [vmem:[%s1946_s28 + $0x58] sm:$0xff] %v1096_v21  ;;  %v1130_v19 = vmul.f32 %v1460_v15, %v1129_v24 }
 0x31f   : > { %1170 = vst [vmem:[%s1946_s28 + $0x68] sm:$0xff] %v1126_v22 }
 0x320   : > { %v1131_v29 = vadd.f32 %v1460_v15, %v1130_v19 }
 0x322   : > { %v1135_v31 = vsel %vm1134_vm14, %v1460_v15, %v1131_v29 }
 0x323   : > { %v1140_v33 = vsel %vm1137_vm15, %v1139_v30, %v1135_v31 }
 0x324   : > { %v1141_v34 = vmul.f32 %v1939_v4, %v1140_v33 }
 0x326   : > { %1171 = vst [vmem:[%s1946_s28 + $0x70] sm:$0xff] %v1141_v34 }
 0x327 PF: > { %s22_s13 = sadd.s32 1, %s1486_s13  }
 0x328   : > { %p19_p7 = scmp.ge.s32.totalorder %s22_s13, 4  }
 0x32a   :  { %21 = sbr.rel (!%p19_p7) target bundleno = 1 (0x1), region = 111 }
 0x32f   :  { %1229 = vsyncpa [#allocation3], 1 }
 0x330   :  { %1231 = vsyncpa [#allocation3 + $0x1], 1 }

</bundles_post_ra>
